<compile_context>
chip_gen: v7x
topology: tpu7x:2x2x1
jax: 0.10.0
libtpu: 0.0.40
codegen_flags: <defaults>
</compile_context>

<pallas_src>
import jax
import jax.numpy as jnp
from jax import lax
from jax.experimental import pallas as pl
from jax.experimental.pallas import tpu as pltpu


def _pick_tile_h(H, max_th=8):
    """Largest divisor of H that is <= max_th (row-tile height)."""
    th = 1
    for d in range(1, min(H, max_th) + 1):
        if H % d == 0:
            th = d
    return th


# ---------------------------------------------------------------------------
# Kernel 1: fused nearest-2x upsample + 3x3 conv (stride 1, "same" padding).
# ---------------------------------------------------------------------------
def _fused_up_conv_kernel(x_ref, xprev_ref, xnext_ref, w_ref, b_ref, o_ref):
    # x_ref    : (TH, W, C)      input rows [r0, r0+TH)
    # xprev_ref: (1, W, C)       input row r0-1 (clamped; zeroed on first tile)
    # xnext_ref: (1, W, C)       input row r0+TH (clamped; zeroed on last tile)
    # w_ref    : (4, 4*C, Cout)  per-phase merged taps, [p, (dr*2+dc)*C+ci, co]
    # b_ref    : (1, Cout)
    # o_ref    : (TH, 2, W, 2*Cout)
    TH, W, C = x_ref.shape
    Cout = b_ref.shape[-1]
    f32 = jnp.float32

    h = pl.program_id(1)
    last = pl.num_programs(1) - 1

    x_mid = x_ref[...].astype(f32)
    prev = xprev_ref[...].astype(f32) * (h > 0).astype(f32)       # zero top pad
    nxt = xnext_ref[...].astype(f32) * (h < last).astype(f32)     # zero bottom pad

    # Rows r0-1 .. r0+TH of the (virtually zero-padded) source image.
    x_ext = jnp.concatenate([prev, x_mid, nxt], axis=0)           # (TH+2, W, C)

    # Column-shifted copies (zero columns at the left/right image borders).
    zcol = jnp.zeros((TH + 2, 1, C), f32)
    x_l = jnp.concatenate([zcol, x_ext[:, :-1, :]], axis=1)       # col j -> j-1
    x_r = jnp.concatenate([x_ext[:, 1:, :], zcol], axis=1)        # col j -> j+1
    cols = (x_l, x_ext, x_r)                                      # offsets -1,0,+1

    # The 9 taps on the ORIGINAL-resolution image, each flattened to a
    # (TH*W, C) matmul operand: slab[r][c] = shift by (row r-1, col c-1).
    slab = [[cols[c][r:r + TH].reshape(TH * W, C) for c in range(3)]
            for r in range(3)]

    # Bias broadcast hoisted once (not per phase / per row).
    bias = jnp.broadcast_to(b_ref[...].astype(f32), (TH * W, Cout))

    rows = []
    for a in range(2):            # output row phase: y = 2*i + a
        phase_cols = []
        for b in range(2):        # output col phase: x = 2*j + b
            p = 2 * a + b
            # im2col over the 4 merged taps -> one big matmul per phase.
            lhs = jnp.concatenate(
                [slab[a + 0][b + 0], slab[a + 0][b + 1],
                 slab[a + 1][b + 0], slab[a + 1][b + 1]], axis=1)  # (TH*W, 4C)
            acc = bias + jnp.dot(lhs, w_ref[p],
                                 preferred_element_type=jnp.float32)
            phase_cols.append(acc.reshape(TH, W, Cout))
        # Interleave the two column phases on the lane dim: (TH, 1, W, 2*Cout)
        rows.append(jnp.concatenate(phase_cols, axis=-1)[:, None, :, :])
    # Single dense, contiguous store per grid step.
    o_ref[...] = jnp.concatenate(rows, axis=1).astype(o_ref.dtype)


def upsample_conv2x(x_nhwc, w_packed, bias, tile_h):
    N, H, W, C = x_nhwc.shape
    Cout = w_packed.shape[-1]
    TH = tile_h

    return pl.pallas_call(
        _fused_up_conv_kernel,
        out_shape=jax.ShapeDtypeStruct((N, H, 2, W, 2 * Cout), x_nhwc.dtype),
        grid=(N, H // TH),
        in_specs=[
            pl.BlockSpec((None, TH, W, C), lambda n, h: (n, h, 0, 0)),
            pl.BlockSpec((None, 1, W, C),
                         lambda n, h: (n, jnp.maximum(h * TH - 1, 0), 0, 0)),
            pl.BlockSpec((None, 1, W, C),
                         lambda n, h: (n, jnp.minimum(h * TH + TH, H - 1), 0, 0)),
            pl.BlockSpec((4, 4 * C, Cout), lambda n, h: (0, 0, 0)),
            pl.BlockSpec((1, Cout), lambda n, h: (0, 0)),
        ],
        out_specs=pl.BlockSpec((None, TH, 2, W, 2 * Cout),
                               lambda n, h: (n, h, 0, 0, 0)),
        compiler_params=pltpu.CompilerParams(
            dimension_semantics=("parallel", "parallel")),
    )(x_nhwc, x_nhwc, x_nhwc, w_packed, bias)


# ---------------------------------------------------------------------------
# Kernel 2: plain nearest-2x upsample (with_conv=False), NCHW in / NCHW out.
# Output (N, C, H, 2, W, 2) reshapes to (N, C, 2H, 2W) for free (contiguous).
# ---------------------------------------------------------------------------
def _nn_upsample_kernel(x_ref, o_ref):
    # x_ref: (C, TH, W)   o_ref: (C, TH, 2, W, 2)
    xv = x_ref[...]
    o_ref[...] = jnp.broadcast_to(xv[:, :, None, :, None], o_ref.shape)


def nearest_upsample2x_nchw(x):
    N, C, H, W = x.shape
    TH = _pick_tile_h(H)
    out6 = pl.pallas_call(
        _nn_upsample_kernel,
        out_shape=jax.ShapeDtypeStruct((N, C, H, 2, W, 2), x.dtype),
        grid=(N, H // TH),
        in_specs=[pl.BlockSpec((None, C, TH, W), lambda n, h: (n, 0, h, 0))],
        out_specs=pl.BlockSpec((None, C, TH, 2, W, 2),
                               lambda n, h: (n, 0, h, 0, 0, 0)),
        compiler_params=pltpu.CompilerParams(
            dimension_semantics=("parallel", "parallel")),
    )(x)
    return out6.reshape(N, C, 2 * H, 2 * W)   # free: contiguous dim merges


# ---------------------------------------------------------------------------
# Upsample module forward.
# ---------------------------------------------------------------------------
def upsample_forward(x_nchw, w_oihw=None, b=None, with_conv=True):
    if not with_conv:
        return nearest_upsample2x_nchw(x_nchw)

    N, C, H, W = x_nchw.shape
    Cout = w_oihw.shape[0]
    x_nhwc = jnp.transpose(x_nchw, (0, 2, 3, 1))        # glue on the 1x tensor

    # Collapse the nearest upsample into the conv: per output phase
    # (a, b) = (y & 1, x & 1) the 3x3 conv on the 2x image becomes a 2x2 conv
    # on the original image with merged taps.
    w_hwio = jnp.transpose(w_oihw, (2, 3, 1, 0)).astype(jnp.float32)
    V = jnp.array([[[1., 0., 0.], [0., 1., 1.]],
                   [[1., 1., 0.], [0., 0., 1.]]], jnp.float32)    # [phase, d, k]
    w_col = jnp.einsum('adh,bew,hwio->abdeio', V, V, w_hwio)      # (2,2,2,2,C,Co)
    w_packed = w_col.reshape(4, 4 * C, Cout)                      # [p, t*C+ci, co]
    bias = b.reshape(1, Cout).astype(jnp.float32)

    TH = _pick_tile_h(H)
    out = upsample_conv2x(x_nhwc, w_packed, bias, TH)
    out = out.reshape(N, 2 * H, 2 * W, Cout)            # free (contiguous)
    return jnp.transpose(out, (0, 3, 1, 2))             # NHWC -> NCHW (glue)


# ---------------------------------------------------------------------------
# Pure-JAX reference (for correctness check only).
# ---------------------------------------------------------------------------
def reference(x_nchw, w_oihw, b, with_conv=True):
    up = jnp.repeat(jnp.repeat(x_nchw, 2, axis=2), 2, axis=3)
    if not with_conv:
        return up
    out = lax.conv_general_dilated(
        up, w_oihw, window_strides=(1, 1), padding=((1, 1), (1, 1)),
        dimension_numbers=("NCHW", "OIHW", "NCHW"),
        precision=lax.Precision.HIGHEST)
    return out + b.reshape(1, -1, 1, 1)


if __name__ == "__main__":
    key = jax.random.PRNGKey(0)
    k_x, k_w, k_b = jax.random.split(key, 3)

    N, C, H, W = 2, 4, 16, 16
    x_nchw = jax.random.normal(k_x, (N, C, H, W), dtype=jnp.float32)

    # Conv2d(C, C, kernel_size=3, padding=1) parameters, PyTorch-style init
    # (deterministic, synthetic — no checkpoint loading).
    fan_in = C * 3 * 3
    bound = 1.0 / (fan_in ** 0.5)
    w_oihw = jax.random.uniform(k_w, (C, C, 3, 3), jnp.float32, -bound, bound)
    b = jax.random.uniform(k_b, (C,), jnp.float32, -bound, bound)

    # with_conv=True path (fused kernel)
    out = jax.block_until_ready(upsample_forward(x_nchw, w_oihw, b, True))
    assert out.shape == (N, C, 2 * H, 2 * W)
    ref = reference(x_nchw, w_oihw, b, True)
    max_err = float(jnp.max(jnp.abs(out - ref)))
    assert jnp.allclose(out, ref, atol=2e-2, rtol=2e-2), max_err

    # with_conv=False path (upsample only, exact)
    out_nc = jax.block_until_ready(upsample_forward(x_nchw, with_conv=False))
    assert jnp.array_equal(out_nc, reference(x_nchw, w_oihw, b, False))

    print("KERNEL_OK")
</pallas_src>

<mosaic_0001>
module attributes {stable_mosaic.version = 11 : i64} {
  func.func @_fused_up_conv_kernel(%arg0: i32, %arg1: i32, %arg2: memref<1x8x16x4xf32, #tpu.memory_space<vmem>>, %arg3: memref<1x1x16x4xf32, #tpu.memory_space<vmem>>, %arg4: memref<1x1x16x4xf32, #tpu.memory_space<vmem>>, %arg5: memref<4x16x4xf32, #tpu.memory_space<vmem>>, %arg6: memref<1x4xf32, #tpu.memory_space<vmem>>, %arg7: memref<1x8x2x16x8xf32, #tpu.memory_space<vmem>>) attributes {dimension_semantics = [#tpu.dimension_semantics<parallel>, #tpu.dimension_semantics<parallel>], iteration_bounds = array<i64: 2, 2>, scalar_prefetch = 0 : i64, scratch_operands = 0 : i64, tpu.core_type = #tpu.core_type<tc>, window_params = [{transform_indices = @transform_0, window_bounds = array<i64: 1, 8, 16, 4>}, {transform_indices = @transform_1, window_bounds = array<i64: 1, 1, 16, 4>}, {transform_indices = @transform_2, window_bounds = array<i64: 1, 1, 16, 4>}, {pipeline_mode = #tpu.pipeline_mode<synchronous>, transform_indices = @transform_3, window_bounds = array<i64: 4, 16, 4>}, {pipeline_mode = #tpu.pipeline_mode<synchronous>, transform_indices = @transform_4, window_bounds = array<i64: 1, 4>}, {transform_indices = @transform_5, window_bounds = array<i64: 1, 8, 2, 16, 8>}]} {
    %c0 = arith.constant 0 : index
    %c0_0 = arith.constant 0 : index
    %c0_1 = arith.constant 0 : index
    %c0_2 = arith.constant 0 : index
    %0 = vector.load %arg2[%c0, %c0_0, %c0_1, %c0_2] : memref<1x8x16x4xf32, #tpu.memory_space<vmem>>, vector<1x8x16x4xf32>
    %1 = vector.shape_cast %0 : vector<1x8x16x4xf32> to vector<8x16x4xf32>
    %c0_3 = arith.constant 0 : index
    %c0_4 = arith.constant 0 : index
    %c0_5 = arith.constant 0 : index
    %c0_6 = arith.constant 0 : index
    %2 = vector.load %arg3[%c0_3, %c0_4, %c0_5, %c0_6] : memref<1x1x16x4xf32, #tpu.memory_space<vmem>>, vector<1x1x16x4xf32>
    %3 = vector.shape_cast %2 : vector<1x1x16x4xf32> to vector<1x16x4xf32>
    %c0_i32 = arith.constant 0 : i32
    %4 = arith.cmpi sgt, %arg1, %c0_i32 : i32
    %5 = arith.extui %4 : i1 to i32
    %6 = arith.sitofp %5 : i32 to f32
    %7 = vector.broadcast %6 : f32 to vector<1x16x4xf32>
    %8 = arith.mulf %3, %7 : vector<1x16x4xf32>
    %c0_7 = arith.constant 0 : index
    %c0_8 = arith.constant 0 : index
    %c0_9 = arith.constant 0 : index
    %c0_10 = arith.constant 0 : index
    %9 = vector.load %arg4[%c0_7, %c0_8, %c0_9, %c0_10] : memref<1x1x16x4xf32, #tpu.memory_space<vmem>>, vector<1x1x16x4xf32>
    %10 = vector.shape_cast %9 : vector<1x1x16x4xf32> to vector<1x16x4xf32>
    %c1_i32 = arith.constant 1 : i32
    %11 = arith.cmpi slt, %arg1, %c1_i32 : i32
    %12 = arith.extui %11 : i1 to i32
    %13 = arith.sitofp %12 : i32 to f32
    %14 = vector.broadcast %13 : f32 to vector<1x16x4xf32>
    %15 = arith.mulf %10, %14 : vector<1x16x4xf32>
    %16 = tpu.concatenate %8, %1, %15 in 0 : vector<1x16x4xf32>, vector<8x16x4xf32>, vector<1x16x4xf32> -> vector<10x16x4xf32>
    %cst = arith.constant 0.000000e+00 : f32
    %17 = vector.broadcast %cst : f32 to vector<10x1x4xf32>
    %18 = vector.extract_strided_slice %16 {offsets = [0, 0, 0], sizes = [10, 15, 4], strides = [1, 1, 1]} : vector<10x16x4xf32> to vector<10x15x4xf32>
    %19 = tpu.concatenate %17, %18 in 1 : vector<10x1x4xf32>, vector<10x15x4xf32> -> vector<10x16x4xf32>
    %20 = vector.extract_strided_slice %16 {offsets = [0, 1, 0], sizes = [10, 15, 4], strides = [1, 1, 1]} : vector<10x16x4xf32> to vector<10x15x4xf32>
    %21 = tpu.concatenate %20, %17 in 1 : vector<10x15x4xf32>, vector<10x1x4xf32> -> vector<10x16x4xf32>
    %22 = vector.extract_strided_slice %19 {offsets = [0, 0, 0], sizes = [8, 16, 4], strides = [1, 1, 1]} : vector<10x16x4xf32> to vector<8x16x4xf32>
    %23 = vector.shape_cast %22 : vector<8x16x4xf32> to vector<128x4xf32>
    %24 = vector.extract_strided_slice %16 {offsets = [0, 0, 0], sizes = [8, 16, 4], strides = [1, 1, 1]} : vector<10x16x4xf32> to vector<8x16x4xf32>
    %25 = vector.shape_cast %24 : vector<8x16x4xf32> to vector<128x4xf32>
    %26 = vector.extract_strided_slice %21 {offsets = [0, 0, 0], sizes = [8, 16, 4], strides = [1, 1, 1]} : vector<10x16x4xf32> to vector<8x16x4xf32>
    %27 = vector.shape_cast %26 : vector<8x16x4xf32> to vector<128x4xf32>
    %28 = vector.extract_strided_slice %19 {offsets = [1, 0, 0], sizes = [8, 16, 4], strides = [1, 1, 1]} : vector<10x16x4xf32> to vector<8x16x4xf32>
    %29 = vector.shape_cast %28 : vector<8x16x4xf32> to vector<128x4xf32>
    %30 = vector.extract_strided_slice %16 {offsets = [1, 0, 0], sizes = [8, 16, 4], strides = [1, 1, 1]} : vector<10x16x4xf32> to vector<8x16x4xf32>
    %31 = vector.shape_cast %30 : vector<8x16x4xf32> to vector<128x4xf32>
    %32 = vector.extract_strided_slice %21 {offsets = [1, 0, 0], sizes = [8, 16, 4], strides = [1, 1, 1]} : vector<10x16x4xf32> to vector<8x16x4xf32>
    %33 = vector.shape_cast %32 : vector<8x16x4xf32> to vector<128x4xf32>
    %34 = vector.extract_strided_slice %19 {offsets = [2, 0, 0], sizes = [8, 16, 4], strides = [1, 1, 1]} : vector<10x16x4xf32> to vector<8x16x4xf32>
    %35 = vector.shape_cast %34 : vector<8x16x4xf32> to vector<128x4xf32>
    %36 = vector.extract_strided_slice %16 {offsets = [2, 0, 0], sizes = [8, 16, 4], strides = [1, 1, 1]} : vector<10x16x4xf32> to vector<8x16x4xf32>
    %37 = vector.shape_cast %36 : vector<8x16x4xf32> to vector<128x4xf32>
    %38 = vector.extract_strided_slice %21 {offsets = [2, 0, 0], sizes = [8, 16, 4], strides = [1, 1, 1]} : vector<10x16x4xf32> to vector<8x16x4xf32>
    %39 = vector.shape_cast %38 : vector<8x16x4xf32> to vector<128x4xf32>
    %c0_11 = arith.constant 0 : index
    %c0_12 = arith.constant 0 : index
    %40 = vector.load %arg6[%c0_11, %c0_12] : memref<1x4xf32, #tpu.memory_space<vmem>>, vector<1x4xf32>
    %41 = vector.shape_cast %40 : vector<1x4xf32> to vector<1x4xf32>
    %42 = vector.broadcast %41 : vector<1x4xf32> to vector<128x4xf32>
    %43 = tpu.concatenate %23, %25, %29, %31 in 1 : vector<128x4xf32>, vector<128x4xf32>, vector<128x4xf32>, vector<128x4xf32> -> vector<128x16xf32>
    %c0_13 = arith.constant 0 : index
    %c0_14 = arith.constant 0 : index
    %c0_15 = arith.constant 0 : index
    %44 = vector.load %arg5[%c0_13, %c0_14, %c0_15] : memref<4x16x4xf32, #tpu.memory_space<vmem>>, vector<1x16x4xf32>
    %45 = vector.shape_cast %44 : vector<1x16x4xf32> to vector<16x4xf32>
    %cst_16 = arith.constant dense<0.000000e+00> : vector<128x4xf32>
    %46 = tpu.matmul %43, %45, %cst_16 {dimension_numbers = #tpu.dot_dimension_numbers<[1], [0], [0], [1], [0, 0, 1, 1], [], []>} : vector<128x16xf32>, vector<16x4xf32>, vector<128x4xf32> -> vector<128x4xf32>
    %47 = arith.addf %42, %46 : vector<128x4xf32>
    %48 = vector.shape_cast %47 : vector<128x4xf32> to vector<8x16x4xf32>
    %49 = tpu.concatenate %25, %27, %31, %33 in 1 : vector<128x4xf32>, vector<128x4xf32>, vector<128x4xf32>, vector<128x4xf32> -> vector<128x16xf32>
    %c1 = arith.constant 1 : index
    %c0_17 = arith.constant 0 : index
    %c0_18 = arith.constant 0 : index
    %50 = vector.load %arg5[%c1, %c0_17, %c0_18] : memref<4x16x4xf32, #tpu.memory_space<vmem>>, vector<1x16x4xf32>
    %51 = vector.shape_cast %50 : vector<1x16x4xf32> to vector<16x4xf32>
    %cst_19 = arith.constant dense<0.000000e+00> : vector<128x4xf32>
    %52 = tpu.matmul %49, %51, %cst_19 {dimension_numbers = #tpu.dot_dimension_numbers<[1], [0], [0], [1], [0, 0, 1, 1], [], []>} : vector<128x16xf32>, vector<16x4xf32>, vector<128x4xf32> -> vector<128x4xf32>
    %53 = arith.addf %42, %52 : vector<128x4xf32>
    %54 = vector.shape_cast %53 : vector<128x4xf32> to vector<8x16x4xf32>
    %55 = tpu.concatenate %48, %54 in 2 : vector<8x16x4xf32>, vector<8x16x4xf32> -> vector<8x16x8xf32>
    %56 = vector.shape_cast %55 : vector<8x16x8xf32> to vector<8x1x16x8xf32>
    %57 = tpu.concatenate %29, %31, %35, %37 in 1 : vector<128x4xf32>, vector<128x4xf32>, vector<128x4xf32>, vector<128x4xf32> -> vector<128x16xf32>
    %c2 = arith.constant 2 : index
    %c0_20 = arith.constant 0 : index
    %c0_21 = arith.constant 0 : index
    %58 = vector.load %arg5[%c2, %c0_20, %c0_21] : memref<4x16x4xf32, #tpu.memory_space<vmem>>, vector<1x16x4xf32>
    %59 = vector.shape_cast %58 : vector<1x16x4xf32> to vector<16x4xf32>
    %cst_22 = arith.constant dense<0.000000e+00> : vector<128x4xf32>
    %60 = tpu.matmul %57, %59, %cst_22 {dimension_numbers = #tpu.dot_dimension_numbers<[1], [0], [0], [1], [0, 0, 1, 1], [], []>} : vector<128x16xf32>, vector<16x4xf32>, vector<128x4xf32> -> vector<128x4xf32>
    %61 = arith.addf %42, %60 : vector<128x4xf32>
    %62 = vector.shape_cast %61 : vector<128x4xf32> to vector<8x16x4xf32>
    %63 = tpu.concatenate %31, %33, %37, %39 in 1 : vector<128x4xf32>, vector<128x4xf32>, vector<128x4xf32>, vector<128x4xf32> -> vector<128x16xf32>
    %c3 = arith.constant 3 : index
    %c0_23 = arith.constant 0 : index
    %c0_24 = arith.constant 0 : index
    %64 = vector.load %arg5[%c3, %c0_23, %c0_24] : memref<4x16x4xf32, #tpu.memory_space<vmem>>, vector<1x16x4xf32>
    %65 = vector.shape_cast %64 : vector<1x16x4xf32> to vector<16x4xf32>
    %cst_25 = arith.constant dense<0.000000e+00> : vector<128x4xf32>
    %66 = tpu.matmul %63, %65, %cst_25 {dimension_numbers = #tpu.dot_dimension_numbers<[1], [0], [0], [1], [0, 0, 1, 1], [], []>} : vector<128x16xf32>, vector<16x4xf32>, vector<128x4xf32> -> vector<128x4xf32>
    %67 = arith.addf %42, %66 : vector<128x4xf32>
    %68 = vector.shape_cast %67 : vector<128x4xf32> to vector<8x16x4xf32>
    %69 = tpu.concatenate %62, %68 in 2 : vector<8x16x4xf32>, vector<8x16x4xf32> -> vector<8x16x8xf32>
    %70 = vector.shape_cast %69 : vector<8x16x8xf32> to vector<8x1x16x8xf32>
    %71 = tpu.concatenate %56, %70 in 1 : vector<8x1x16x8xf32>, vector<8x1x16x8xf32> -> vector<8x2x16x8xf32>
    %c0_26 = arith.constant 0 : index
    %c0_27 = arith.constant 0 : index
    %c0_28 = arith.constant 0 : index
    %c0_29 = arith.constant 0 : index
    %c0_30 = arith.constant 0 : index
    %72 = vector.load %arg7[%c0_26, %c0_27, %c0_28, %c0_29, %c0_30] : memref<1x8x2x16x8xf32, #tpu.memory_space<vmem>>, vector<1x8x2x16x8xf32>
    %73 = vector.shape_cast %72 : vector<1x8x2x16x8xf32> to vector<8x2x16x8xf32>
    %74 = vector.shape_cast %71 : vector<8x2x16x8xf32> to vector<1x8x2x16x8xf32>
    tpu.vector_store %arg7[%c0_26, %c0_27, %c0_28, %c0_29, %c0_30], %74 {strides = array<i32>} : memref<1x8x2x16x8xf32, #tpu.memory_space<vmem>>, vector<1x8x2x16x8xf32>,
    return
  }
  func.func @transform_0(%arg0: i32, %arg1: i32) -> (i32, i32, i32, i32) {
    %c0_i32 = arith.constant 0 : i32
    %c0_i32_0 = arith.constant 0 : i32
    %c0_i32_1 = arith.constant 0 : i32
    return %arg0, %arg1, %c0_i32, %c0_i32_0 : i32, i32, i32, i32
  }
  func.func @transform_1(%arg0: i32, %arg1: i32) -> (i32, i32, i32, i32) {
    %c8_i32 = arith.constant 8 : i32
    %0 = arith.muli %arg1, %c8_i32 : i32
    %c1_i32 = arith.constant 1 : i32
    %1 = arith.subi %0, %c1_i32 : i32
    %c0_i32 = arith.constant 0 : i32
    %2 = arith.maxsi %1, %c0_i32 : i32
    %c0_i32_0 = arith.constant 0 : i32
    %c0_i32_1 = arith.constant 0 : i32
    %c0_i32_2 = arith.constant 0 : i32
    return %arg0, %2, %c0_i32_0, %c0_i32_1 : i32, i32, i32, i32
  }
  func.func @transform_2(%arg0: i32, %arg1: i32) -> (i32, i32, i32, i32) {
    %c8_i32 = arith.constant 8 : i32
    %0 = arith.muli %arg1, %c8_i32 : i32
    %c8_i32_0 = arith.constant 8 : i32
    %1 = arith.addi %0, %c8_i32_0 : i32
    %c15_i32 = arith.constant 15 : i32
    %2 = arith.minsi %1, %c15_i32 : i32
    %c0_i32 = arith.constant 0 : i32
    %c0_i32_1 = arith.constant 0 : i32
    %c0_i32_2 = arith.constant 0 : i32
    return %arg0, %2, %c0_i32, %c0_i32_1 : i32, i32, i32, i32
  }
  func.func @transform_3(%arg0: i32, %arg1: i32) -> (i32, i32, i32) {
    %c0_i32 = arith.constant 0 : i32
    %c0_i32_0 = arith.constant 0 : i32
    %c0_i32_1 = arith.constant 0 : i32
    %c0_i32_2 = arith.constant 0 : i32
    return %c0_i32, %c0_i32_0, %c0_i32_1 : i32, i32, i32
  }
  func.func @transform_4(%arg0: i32, %arg1: i32) -> (i32, i32) {
    %c0_i32 = arith.constant 0 : i32
    %c0_i32_0 = arith.constant 0 : i32
    %c0_i32_1 = arith.constant 0 : i32
    return %c0_i32, %c0_i32_0 : i32, i32
  }
  func.func @transform_5(%arg0: i32, %arg1: i32) -> (i32, i32, i32, i32, i32) {
    %c0_i32 = arith.constant 0 : i32
    %c0_i32_0 = arith.constant 0 : i32
    %c0_i32_1 = arith.constant 0 : i32
    %c0_i32_2 = arith.constant 0 : i32
    return %arg0, %arg1, %c0_i32, %c0_i32_0, %c0_i32_1 : i32, i32, i32, i32, i32
  }
}

</mosaic_0001>

<bundles_post_ra>
// kernel: tpu_custom_call.1
= control target key start
LH: loop header
LB: loop body
LE: loop exit
PB: predicated region body
PF: predicated region fallthrough
CT: control target
= control target key end

     0   :  { %s2541_s18 = smov 0   ;;  %s2543_s19 = smov 0   ;;  %s3484_s0 = inlined_call_operand.vmem [shape: f32[2,16,16,4], index: 0, kind: input, shape index: {}]   ;;  %s3485_s1 = inlined_call_operand.vmem [shape: f32[2,16,16,4], index: 1, kind: input, shape index: {}]   ;;  %s3486_s2 = inlined_call_operand.vmem [shape: f32[2,16,16,4], index: 2, kind: input, shape index: {}]   ;;  %s3487_s3 = inlined_call_operand.vmem [shape: f32[4,16,4], index: 3, kind: input, shape index: {}]   ;;  %s3488_s4 = inlined_call_operand.vmem [shape: f32[1,4], index: 4, kind: input, shape index: {}]   ;;  %s3489_s5 = inlined_call_operand.vmem [shape: f32[2,16,2,16,8], index: 5, kind: output, shape index: {}]  }
   0x1   :  { %s2545_s20 = smov 0   ;;  %s2547_s21 = smov 0  }
   0x2   :  { %s2549_s22 = smov 0  }
   0x3 LB: > { %s24_s23 = sadd.s32 1, %s2498_s20  ;;  %s27_s24 = sadd.s32 1, %s2502_s21  ;;  %s2506_s22 = sphi %s2549_s22, %s15_s22   ;;  %s2502_s21 = sphi %s2547_s21, %s3494_s21   ;;  %s2498_s20 = sphi %s2545_s20, %s3493_s20   ;;  %s2494_s19 = sphi %s2543_s19, %s3492_s19   ;;  %s2490_s18 = sphi %s2541_s18, %s3491_s18  }
   0x4   : > { %p25_p0 = scmp.ge.s32.totalorder %s24_s23, 2  ;;  %p2124_p1 = scmp.ge.s32.totalorder %s2506_s22, 1 }
   0x5   : > { %p273_p2 = scmp.lt.s32.totalorder %s2506_s22, 5 }
   0x6   : > { %s3496_s23 = smov (%p25_p0, %s24_s23), 0  ;;  %s3498_s24 = smov (!%p25_p0, %s27_s24), %s2502_s21 }
   0x7   : > { %p274_p3 = pnand %p2124_p1, %p273_p2  ;;  %p29_p4 = scmp.ge.s32.totalorder %s3498_s24, 2 }
   0x8   : > { %s2574_s25 = sshll.u32 (!%p274_p3), %s2490_s18, 3  ;;  %p338_p5 = scmp.lt.s32.totalorder (!%p274_p3), %s2494_s19, 1  ;;  %vm505_vm0 = vcmask (!%p274_p3), 1046528   ;;  %v2167_v7 = vld [vmem:[%s3487_s3 + $0x10] sm:$0xff] (!%p274_p3)  ;;  %v2168_v8 = vld [vmem:[%s3487_s3 + $0x18] sm:$0xff] (!%p274_p3)  ;;  %vm445_vm1 = vcmask (!%p274_p3), 1040384  }
   0x9   : > { %s3500_s24 = smov (%p29_p4, %s3498_s24), 0  ;;  %277 = sbr.rel (%p274_p3) target bundleno = 597 (0x255), region = 40 }
   0xa   : > { %p340_p6 = scmp.lt.s32.totalorder (!%p274_p3), %s2574_s25, 15  ;;  %s2508_s12 = smov (!%p274_p3), 8   ;;  %v2413_v11 = vpack.c.bf16 (!%p274_p3), %v2168_v8, %v2167_v7  ;;  %v2203_v41 = vld [vmem:[%s3487_s3 + $0x30] sm:$0xff] (!%p274_p3)  ;;  %v2204_v42 = vld [vmem:[%s3487_s3 + $0x38] sm:$0xff] (!%p274_p3)  ;;  %vm715_vm2 = vcmask (!%p274_p3), 31744   ;;  %vm749_vm3 = vcmask (!%p274_p3), 97280  }
   0xb   : > { %s2130_s13 = sadd.s32 (!%p274_p3), 4294967295, %s2574_s25  ;;  %p411_p7 = scmp.gt.s32.totalorder (!%p274_p3), %s2490_s18, 0  ;;  %v2715_v43 = vpack.c.bf16 (!%p274_p3), %v2204_v42, %v2203_v41  ;;  %vm732_vm4 = vcmask (!%p274_p3), 64512   ;;  %vm768_vm5 = vcmask (!%p274_p3), 130048  }
   0xc   : > { %p350_p8 = scmp.gt.s32.totalorder (!%p274_p3), %s2130_s13, 0  ;;  %p2131_p9 = scmp.lt.s32.totalorder (!%p274_p3), %s2130_s13, 15  ;;  %2414 = vmatprep.subr.bf16.mxu1 (!%p274_p3), %v2413_v11 }
   0xd   : > { %s2509_s15 = smov (!%p274_p3), 12   ;;  %s366_s17 = sadd.s32 (!%p274_p3), 8, %s2574_s25  ;;  %2416 = vmatpush3.bf16.msra.mxu1 (!%p274_p3), %v2413_v11 }
   0xe   : > { %p2611_p10 = scmp.lt.s32.totalorder (!%p274_p3), %s366_s17, 15  ;;  %2422 = vmatprep.subr.bf16.mxu1 (!%p274_p3), %v2715_v43  ;;  %p419_p11 = scmp.lt.s32.totalorder (!%p274_p3), %s2490_s18, 1 }
  0x10   : > { %s3502_s19 = smov (!%p338_p5, %s2494_s19), 1  ;;  %s3504_s13 = smov (!%p350_p8, %s2130_s13), 0 }
  0x11   : > { %s341_s26 = scalar_select %p340_p6, %s2574_s25, 15 }
  0x12   : > { %s2578_s27 = sshll.u32 %s3502_s19, 5  ;;  %s2148_s28 = sshll.u32 %s3502_s19, 6 }
  0x13   : > { %s2126_s29 = sshll.u32 %s341_s26, 1  ;;  %s2147_s30 = sshll.u32 %s341_s26, 2 }
  0x14   : > { %s344_s6 = sadd.s32 %s2578_s27, %s2126_s29  ;;  %s2581_s7 = sadd.s32 %s2148_s28, %s2147_s30 }
  0x15   : > { %s2128_s8 = sshll.u32 %s344_s6, 3  ;;  %s3506_s13 = smov (!%p2131_p9, %s3504_s13), 15 }
  0x16   : > { %s2586_s11 = scalar_lea.vmem %s3484_s0, %s2128_s8  ;;  %s2136_s19 = sshll.u32 %s3506_s13, 1 }
  0x17   : > { %v2589_v0 = vld [vmem:[%s2586_s11 + $0x10] sm:$0xff]  ;;  %v2592_v1 = vld [vmem:[%s2586_s11] sm:$0xff]  ;;  %v2595_v2 = vld [vmem:[%s2586_s11 + $0x8] sm:$0xff]  ;;  %s412_s14 = scalar_select %p411_p7, 1, 0 }
  0x18   : > { %1038 = vrot.lane.b32.xlu0 %v2589_v0, %s2508_s12  ;;  %1034 = vrot.lane.b32.xlu1 %v2592_v1, %s2508_s12  ;;  %v509_v3 = vrot.slane %v2592_v1, 1  ;;  %v510_v4 = vrot.slane %v2595_v2, 1  ;;  %s2510_s25 = smov 4   ;;  %s358_s8 = sadd.s32 %s2136_s19, %s2578_s27  ;;  %v2628_v10 = vld [vmem:[%s2586_s11 + $0x18] sm:$0xff]  ;;  %v512_v22 = vrot.slane %v2589_v0, 1  ;;  %v2657_v24 = vld [vmem:[%s2586_s11 + $0x28] sm:$0xff] }
  0x19   : > { %s413_s16 = scvt.s32.f32 %s412_s14  ;;  %s2138_s9 = sshll.u32 %s358_s8, 3  ;;  %v513_v16 = vrot.slane %v2628_v10, 1  ;;  %v516_v25 = vrot.slane %v2657_v24, 1  ;;  %v2663_v26 = vld [vmem:[%s2586_s11 + $0x20] sm:$0xff]  ;;  %v2675_v30 = vld [vmem:[%s2586_s11 + $0x38] sm:$0xff]  ;;  %v2681_v32 = vld [vmem:[%s2586_s11 + $0x30] sm:$0xff] }
  0x1a   : > { %v511_v5 = vsel %vm505_vm0, %v509_v3, %v510_v4  ;;  %v547_v6 = vsel %vm505_vm0, %v510_v4, 0.0  ;;  %s360_s14 = scalar_lea.vmem %s3485_s1, %s2138_s9  ;;  %s3508_s17 = smov (!%p2611_p10, %s366_s17), 15  ;;  %v515_v28 = vrot.slane %v2663_v26, 1  ;;  %v519_v31 = vrot.slane %v2675_v30, 1  ;;  %v2693_v36 = vld [vmem:[%s2586_s11 + $0x48] sm:$0xff]  ;;  %v2699_v38 = vld [vmem:[%s2586_s11 + $0x40] sm:$0xff] }
  0x1b   : > { %v414_v9 = vstv %s413_s16  ;;  %v409_v12 = vld [vmem:[%s360_s14] sm:$0xff]  ;;  %v410_v13 = vld [vmem:[%s360_s14 + $0x8] sm:$0xff]  ;;  %s3510_s17 = smov (!%p2611_p10, %s3508_s17), 15  ;;  %v548_v20 = vsel %vm505_vm0, %v513_v16, 0.0  ;;  %v514_v23 = vsel %vm505_vm0, %v512_v22, %v513_v16  ;;  %v549_v27 = vsel %vm505_vm0, %v516_v25, 0.0  ;;  %v2719_v45 = vld [vmem:[%s2586_s11 + $0x58] sm:$0xff] }
  0x1c   : > { %1036 = vrot.lane.b32.xlu1 %v2595_v2, %s2508_s12  ;;  %1083 = vrot.lane.b32.xlu0 %v511_v5, %s2509_s15  ;;  %v2633_v14 = vmul.f32 %v414_v9, %v409_v12  ;;  %v2635_v15 = vmul.f32 %v414_v9, %v410_v13  ;;  %s2642_s16 = sshll.u32 %s3510_s17, 1  ;;  %v517_v29 = vsel %vm505_vm0, %v515_v28, %v516_v25  ;;  %v550_v33 = vsel %vm505_vm0, %v519_v31, 0.0  ;;  %v2726_v47 = vld [vmem:[%s2586_s11 + $0x50] sm:$0xff]  ;;  %v2738_v51 = vld [vmem:[%s2586_s11 + $0x68] sm:$0xff]  ;;  %s2149_s28 = sshll.u32 %s2581_s7, 3 }
  0x1d   : > { %s375_s19 = sadd.s32 %s2642_s16, %s2578_s27  ;;  %v518_v34 = vrot.slane %v2681_v32, 1  ;;  %v522_v37 = vrot.slane %v2693_v36, 1  ;;  %v521_v40 = vrot.slane %v2699_v38, 1  ;;  %v525_v46 = vrot.slane %v2719_v45, 1  ;;  %v2744_v53 = vld [vmem:[%s2586_s11 + $0x60] sm:$0xff]  ;;  %v2756_v57 = vld [vmem:[%s2586_s11 + $0x78] sm:$0xff]  ;;  %s3339_s30 = scalar_lea.vmem %s3489_s5, %s2149_s28 }
  0x1e   : > { %v506_v17 = vrot.slane %v2633_v14, 1  ;;  %v507_v18 = vrot.slane %v2635_v15, 1  ;;  %v524_v49 = vrot.slane %v2726_v47, 1  ;;  %v528_v52 = vrot.slane %v2738_v51, 1  ;;  %v2762_v59 = vld [vmem:[%s2586_s11 + $0x70] sm:$0xff]  ;;  %v766_v4 = vld [vmem:[%s3487_s3] sm:$0xff] }
  0x1f   : > { %v520_v35 = vsel %vm505_vm0, %v518_v34, %v519_v31  ;;  %v551_v39 = vsel %vm505_vm0, %v522_v37, 0.0  ;;  %v523_v44 = vsel %vm505_vm0, %v521_v40, %v522_v37  ;;  %v552_v48 = vsel %vm505_vm0, %v525_v46, 0.0  ;;  %s420_s11 = scalar_select %p419_p11, 1, 0 }
  0x20   : > { %1085 = vrot.lane.b32.xlu1 %v547_v6, %s2509_s15  ;;  %990 = vrot.lane.b32.xlu0 %v511_v5, %s2510_s25  ;;  %v508_v19 = vsel %vm505_vm0, %v506_v17, %v507_v18  ;;  %v546_v21 = vsel %vm505_vm0, %v507_v18, 0.0  ;;  %v526_v50 = vsel %vm505_vm0, %v524_v49, %v525_v46  ;;  %v553_v54 = vsel %vm505_vm0, %v528_v52, 0.0  ;;  %v767_v5 = vld [vmem:[%s3487_s3 + $0x8] sm:$0xff]  ;;  %s2145_s18 = sshll.u32 %s375_s19, 3 }
  0x21   : > { %v527_v55 = vrot.slane %v2744_v53, 1  ;;  %v531_v58 = vrot.slane %v2756_v57, 1  ;;  %v530_v61 = vrot.slane %v2762_v59, 1  ;;  %v449_v62 = vrot.slane %v2592_v1, 7  ;;  %s421_s10 = scvt.s32.f32 %s420_s11  ;;  %s377_s17 = scalar_lea.vmem %s3486_s2, %s2145_s18 }
  0x22   : > { %v450_v63 = vrot.slane %v2595_v2, 7  ;;  %v417_v9 = vld [vmem:[%s377_s17] sm:$0xff]  ;;  %v418_v12 = vld [vmem:[%s377_s17 + $0x8] sm:$0xff]  ;;  %v453_v25 = vrot.slane %v2628_v10, 7  ;;  %v455_v37 = vrot.slane %v2663_v26, 7 }
  0x23   : > { %v529_v56 = vsel %vm505_vm0, %v527_v55, %v528_v52  ;;  %v554_v60 = vsel %vm505_vm0, %v531_v58, 0.0  ;;  %v532_v3 = vsel %vm505_vm0, %v530_v61, %v531_v58  ;;  %v2799_v8 = vsel %vm445_vm1, 0.0, %v449_v62 }
  0x24   : > { %992 = vrot.lane.b32.xlu1 %v547_v6, %s2510_s25  ;;  %986 = vrot.lane.b32.xlu0 %v508_v19, %s2510_s25  ;;  %v2409_v6 = vpack.c.bf16 %v767_v5, %v766_v4  ;;  %v2789_v7 = vsel %vm445_vm1, %v449_v62, %v450_v63  ;;  %v422_v11 = vstv %s421_s10  ;;  %v2866_v58 = vsel %vm445_vm1, 0.0, %v455_v37 }
  0x25   : > { %v2804_v13 = vmul.f32 %v422_v11, %v417_v9  ;;  %v2806_v16 = vmul.f32 %v422_v11, %v418_v12  ;;  %v458_v4 = vrot.slane %v2681_v32, 7 }
  0x26   : > { %2410 = vmatprep.subr.bf16.mxu0 %v2409_v6 }
  0x27   : > { %2412 = vmatpush3.bf16.msra.mxu0 %v2409_v6  ;;  %v533_v17 = vrot.slane %v2804_v13, 1  ;;  %v534_v18 = vrot.slane %v2806_v16, 1 }
  0x28   : > { %1040 = vrot.lane.b32.xlu1 %v2628_v10, %s2508_s12  ;;  %988 = vrot.lane.b32.xlu0 %v546_v21, %s2510_s25 }
  0x29   : > { %v535_v19 = vsel %vm505_vm0, %v533_v17, %v534_v18  ;;  %v555_v34 = vsel %vm505_vm0, %v534_v18, 0.0 }
  0x2c   : > { %1089 = vrot.lane.b32.xlu1 %v548_v20, %s2509_s15  ;;  %1087 = vrot.lane.b32.xlu0 %v514_v23, %s2509_s15 }
  0x30   : > { %996 = vrot.lane.b32.xlu1 %v548_v20, %s2510_s25  ;;  %994 = vrot.lane.b32.xlu0 %v514_v23, %s2510_s25  ;;  %v452_v20 = vrot.slane %v2589_v0, 7 }
  0x32   : > { %v2823_v23 = vsel %vm445_vm1, 0.0, %v452_v20 }
  0x34   : > { %1044 = vrot.lane.b32.xlu1 %v2657_v24, %s2508_s12  ;;  %1042 = vrot.lane.b32.xlu0 %v2663_v26, %s2508_s12 }
  0x38   : > { %1093 = vrot.lane.b32.xlu1 %v549_v27, %s2509_s15  ;;  %1091 = vrot.lane.b32.xlu0 %v517_v29, %s2509_s15 }
  0x3c   : > { %1000 = vrot.lane.b32.xlu1 %v549_v27, %s2510_s25  ;;  %998 = vrot.lane.b32.xlu0 %v517_v29, %s2510_s25  ;;  %v2831_v29 = vsel %vm445_vm1, %v452_v20, %v453_v25  ;;  %v2907_v20 = vsel %vm445_vm1, 0.0, %v458_v4 }
  0x40   : > { %1048 = vrot.lane.b32.xlu1 %v2675_v30, %s2508_s12  ;;  %1046 = vrot.lane.b32.xlu0 %v2681_v32, %s2508_s12 }
  0x44   : > { %1097 = vrot.lane.b32.xlu1 %v550_v33, %s2509_s15  ;;  %1095 = vrot.lane.b32.xlu0 %v520_v35, %s2509_s15 }
  0x48   : > { %1004 = vrot.lane.b32.xlu1 %v550_v33, %s2510_s25  ;;  %1002 = vrot.lane.b32.xlu0 %v520_v35, %s2510_s25 }
  0x4c   : > { %1052 = vrot.lane.b32.xlu1 %v2693_v36, %s2508_s12  ;;  %1050 = vrot.lane.b32.xlu0 %v2699_v38, %s2508_s12 }
  0x50   : > { %1101 = vrot.lane.b32.xlu1 %v551_v39, %s2509_s15  ;;  %1099 = vrot.lane.b32.xlu0 %v523_v44, %s2509_s15 }
  0x54   : > { %1008 = vrot.lane.b32.xlu1 %v551_v39, %s2510_s25  ;;  %1006 = vrot.lane.b32.xlu0 %v523_v44, %s2510_s25  ;;  %v456_v39 = vrot.slane %v2657_v24, 7 }
  0x56   : > { %v2851_v46 = vsel %vm445_vm1, %v455_v37, %v456_v39 }
  0x58   : > { %1056 = vrot.lane.b32.xlu1 %v2719_v45, %s2508_s12  ;;  %1054 = vrot.lane.b32.xlu0 %v2726_v47, %s2508_s12 }
  0x5c   : > { %1105 = vrot.lane.b32.xlu1 %v552_v48, %s2509_s15  ;;  %1103 = vrot.lane.b32.xlu0 %v526_v50, %s2509_s15 }
  0x60   : > { %1012 = vrot.lane.b32.xlu1 %v552_v48, %s2510_s25  ;;  %1010 = vrot.lane.b32.xlu0 %v526_v50, %s2510_s25 }
  0x64   : > { %1060 = vrot.lane.b32.xlu1 %v2738_v51, %s2508_s12  ;;  %1058 = vrot.lane.b32.xlu0 %v2744_v53, %s2508_s12 }
  0x68   : > { %1109 = vrot.lane.b32.xlu1 %v553_v54, %s2509_s15  ;;  %1107 = vrot.lane.b32.xlu0 %v529_v56, %s2509_s15 }
  0x6c   : > { %1016 = vrot.lane.b32.xlu1 %v553_v54, %s2510_s25  ;;  %1014 = vrot.lane.b32.xlu0 %v529_v56, %s2510_s25 }
  0x70   : > { %1064 = vrot.lane.b32.xlu1 %v2756_v57, %s2508_s12  ;;  %1062 = vrot.lane.b32.xlu0 %v2762_v59, %s2508_s12 }
  0x74   : > { %1113 = vrot.lane.b32.xlu1 %v554_v60, %s2509_s15  ;;  %1111 = vrot.lane.b32.xlu0 %v532_v3, %s2509_s15 }
  0x78   : > { %565 = vrot.lane.b32.xlu1 %v2635_v15, %s2510_s25  ;;  %563 = vrot.lane.b32.xlu0 %v2633_v14, %s2510_s25 }
  0x7c   : > { %621 = vrot.lane.b32.xlu1 %v2789_v7, %s2508_s12  ;;  %619 = vrot.lane.b32.xlu0 %v2799_v8, %s2508_s12 }
  0x80   : > { %1666 = vrot.lane.b32.xlu1 %v532_v3, %s2510_s25  ;;  %667 = vrot.lane.b32.xlu0 %v2592_v1, %s2509_s15 }
  0x84   : > { %1668 = vrot.lane.b32.xlu1 %v554_v60, %s2510_s25  ;;  %669 = vrot.lane.b32.xlu0 %v2595_v2, %s2509_s15 }
  0x88   : > { %567 = vrot.lane.b32.xlu1 %v2592_v1, %s2510_s25  ;;  %1672 = vrot.lane.b32.xlu0 %v2804_v13, %s2508_s12 }
  0x8a   : > { %v1039_v21 = vpop.permute.xlu0 %1038  ;;  %v1035_v22 = vpop.permute.xlu1 %1034 }
  0x8c   : > { %1679 = vrot.lane.b32.xlu1 %v535_v19, %s2509_s15  ;;  %1674 = vrot.lane.b32.xlu0 %v2806_v16, %s2508_s12 }
  0x8e   : > { %v1037_v27 = vpop.permute.xlu1 %1036  ;;  %v1084_v28 = vpop.permute.xlu0 %1083 }
  0x90   : > { %623 = vrot.lane.b32.xlu1 %v2823_v23, %s2508_s12  ;;  %569 = vrot.lane.b32.xlu0 %v2595_v2, %s2510_s25 }
  0x92   : > { %v1086_v31 = vpop.permute.xlu1 %1085  ;;  %v991_v33 = vpop.permute.xlu0 %990 }
  0x93   : > { %v1133_v52 = vsel %vm715_vm2, %v2592_v1, %v991_v33 }
  0x94   : > { %625 = vrot.lane.b32.xlu1 %v2831_v29, %s2508_s12  ;;  %1681 = vrot.lane.b32.xlu0 %v555_v34, %s2509_s15  ;;  %v1149_v1 = vsel %vm732_vm4, %v1133_v52, %v1039_v21  ;;  %v465_v52 = vrot.slane %v2719_v45, 7 }
  0x96   : > { %v993_v35 = vpop.permute.xlu1 %992  ;;  %v987_v41 = vpop.permute.xlu0 %986 }
  0x97   : > { %v1131_v42 = vsel %vm715_vm2, %v2633_v14, %v987_v41  ;;  %v1134_v62 = vsel %vm715_vm2, %v2595_v2, %v993_v35  ;;  %v459_v2 = vrot.slane %v2675_v30, 7 }
  0x98   : > { %673 = vrot.lane.b32.xlu1 %v2628_v10, %s2509_s15  ;;  %671 = vrot.lane.b32.xlu0 %v2589_v0, %s2509_s15  ;;  %v1147_v44 = vsel %vm732_vm4, %v1131_v42, %v1035_v22 }
  0x99   : > { %v1163_v48 = vsel %vm749_vm3, %v1147_v44, %v1084_v28  ;;  %v2895_v9 = vsel %vm445_vm1, %v458_v4, %v459_v2  ;;  %v462_v28 = vrot.slane %v2693_v36, 7 }
  0x9a   : > { %v1041_v40 = vpop.permute.xlu1 %1040  ;;  %2329 = vmatprep.mubr.msk.f32.mxu1 %vm768_vm5, %v1163_v48  ;;  %v989_v50 = vpop.permute.xlu0 %988 }
  0x9b   : > { %v1132_v54 = vsel %vm715_vm2, %v2635_v15, %v989_v50  ;;  %v1150_v3 = vsel %vm732_vm4, %v1134_v62, %v1041_v40  ;;  %v2186_v62 = vld [vmem:[%s3487_s3 + $0x28] sm:$0xff] }
  0x9c   : > { %573 = vrot.lane.b32.xlu1 %v2628_v10, %s2510_s25  ;;  %v1148_v55 = vsel %vm732_vm4, %v1132_v54, %v1037_v27  ;;  %571 = vrot.lane.b32.xlu0 %v2589_v0, %s2510_s25 }
  0x9d   : > { %v1164_v56 = vsel %vm749_vm3, %v1148_v55, %v1086_v31 }
  0x9e   : > { %v1090_v49 = vpop.permute.xlu1 %1089  ;;  %2330 = vmatmul.mubr.msk.f32.vlgmr.msra.gmra.mrb[0].mxu1 %vm768_vm5, %v1164_v56  ;;  %v1088_v61 = vpop.permute.xlu0 %1087 }
  0x9f   : > { %v2873_v63 = vsel %vm749_vm3, %v1149_v1, %v1088_v61  ;;  %2424 = vmatpush3.bf16.msra.mxu1 %v2715_v43  ;;  %v2886_v5 = vsel %vm749_vm3, %v1150_v3, %v1090_v49  ;;  %v2185_v61 = vld [vmem:[%s3487_s3 + $0x20] sm:$0xff] }
  0xa0   : > { %629 = vrot.lane.b32.xlu1 %v2851_v46, %s2508_s12  ;;  %2332 = vmatprep.mubr.msk.f32.mxu1 %vm768_vm5, %v2873_v63  ;;  %v2981_v4 = vpack.c.bf16 %v2186_v62, %v2185_v61 }
  0xa1   : > { %627 = vrot.lane.b32.xlu0 %v2866_v58, %s2508_s12 }
  0xa2   : > { %v997_v60 = vpop.permute.xlu1 %996  ;;  %2333 = vmatmul.mubr.msk.f32.gmra.mrb[2].mxu1 %vm768_vm5, %v2886_v5  ;;  %v995_v43 = vpop.permute.xlu0 %994  ;;  %2418 = vmatprep.subr.bf16.mxu0 %v2981_v4 }
  0xa3   : > { %v1136_v17 = vsel %vm715_vm2, %v2628_v10, %v997_v60  ;;  %v1135_v18 = vsel %vm715_vm2, %v2589_v0, %v995_v43  ;;  %v461_v0 = vrot.slane %v2699_v38, 7 }
  0xa4   : > { %677 = vrot.lane.b32.xlu1 %v2657_v24, %s2509_s15 }
  0xa5   : > { %675 = vrot.lane.b32.xlu0 %v2663_v26, %s2509_s15  ;;  %v2931_v34 = vsel %vm445_vm1, %v461_v0, %v462_v28  ;;  %v2943_v42 = vsel %vm445_vm1, 0.0, %v461_v0 }
  0xa6   : > { %v1045_v6 = vpop.permute.xlu1 %1044  ;;  %v1043_v12 = vpop.permute.xlu0 %1042 }
  0xa7   : > { %v1152_v19 = vsel %vm732_vm4, %v1136_v17, %v1045_v6  ;;  %v1151_v22 = vsel %vm732_vm4, %v1135_v18, %v1043_v12 }
  0xa8   : > { %577 = vrot.lane.b32.xlu1 %v2657_v24, %s2510_s25 }
  0xa9   : > { %575 = vrot.lane.b32.xlu0 %v2663_v26, %s2510_s25 }
  0xaa   : > { %v1094_v11 = vpop.permute.xlu1 %1093  ;;  %v1092_v27 = vpop.permute.xlu0 %1091 }
  0xab   : > { %v2911_v25 = vsel %vm749_vm3, %v1152_v19, %v1094_v11  ;;  %v2914_v10 = vsel %vm749_vm3, %v1151_v22, %v1092_v27  ;;  %v468_v19 = vrot.slane %v2738_v51, 7 }
  0xac   : > { %633 = vrot.lane.b32.xlu1 %v2895_v9, %s2508_s12  ;;  %2335 = vmatprep.mubr.msk.f32.mxu1 %vm768_vm5, %v2914_v10 }
  0xad   : > { %631 = vrot.lane.b32.xlu0 %v2907_v20, %s2508_s12  ;;  %2336 = vmatmul.mubr.msk.f32.gmra.mrb[4].mxu1 %vm768_vm5, %v2911_v25 }
  0xae   : > { %v1001_v21 = vpop.permute.xlu1 %1000  ;;  %v999_v33 = vpop.permute.xlu0 %998 }
  0xaf   : > { %v1138_v39 = vsel %vm715_vm2, %v2657_v24, %v1001_v21  ;;  %v1137_v40 = vsel %vm715_vm2, %v2663_v26, %v999_v33  ;;  %v464_v26 = vrot.slane %v2726_v47, 7 }
  0xb0   : > { %681 = vrot.lane.b32.xlu1 %v2675_v30, %s2509_s15 }
  0xb1   : > { %679 = vrot.lane.b32.xlu0 %v2681_v32, %s2509_s15  ;;  %v2967_v56 = vsel %vm445_vm1, %v464_v26, %v465_v52  ;;  %v2987_v43 = vsel %vm445_vm1, 0.0, %v464_v26 }
  0xb2   : > { %v1049_v31 = vpop.permute.xlu1 %1048  ;;  %v1047_v37 = vpop.permute.xlu0 %1046 }
  0xb3   : > { %v1154_v41 = vsel %vm732_vm4, %v1138_v39, %v1049_v31  ;;  %v1153_v48 = vsel %vm732_vm4, %v1137_v40, %v1047_v37 }
  0xb4   : > { %581 = vrot.lane.b32.xlu1 %v2675_v30, %s2510_s25 }
  0xb5   : > { %579 = vrot.lane.b32.xlu0 %v2681_v32, %s2510_s25 }
  0xb6   : > { %v1098_v35 = vpop.permute.xlu1 %1097  ;;  %v1096_v50 = vpop.permute.xlu0 %1095 }
  0xb7   : > { %v2947_v49 = vsel %vm749_vm3, %v1154_v41, %v1098_v35  ;;  %v2950_v24 = vsel %vm749_vm3, %v1153_v48, %v1096_v50  ;;  %v471_v48 = vrot.slane %v2756_v57, 7 }
  0xb8   : > { %637 = vrot.lane.b32.xlu1 %v2931_v34, %s2508_s12  ;;  %2338 = vmatprep.mubr.msk.f32.mxu1 %vm768_vm5, %v2950_v24 }
  0xb9   : > { %635 = vrot.lane.b32.xlu0 %v2943_v42, %s2508_s12  ;;  %2339 = vmatmul.mubr.msk.f32.gmra.mrb[6].mxu1 %vm768_vm5, %v2947_v49 }
  0xba   : > { %v1005_v44 = vpop.permute.xlu1 %1004  ;;  %v1003_v55 = vpop.permute.xlu0 %1002 }
  0xbb   : > { %v1140_v3 = vsel %vm715_vm2, %v2675_v30, %v1005_v44  ;;  %v1139_v2 = vsel %vm715_vm2, %v2681_v32, %v1003_v55  ;;  %v467_v32 = vrot.slane %v2744_v53, 7 }
  0xbc   : > { %685 = vrot.lane.b32.xlu1 %v2693_v36, %s2509_s15 }
  0xbd   : > { %683 = vrot.lane.b32.xlu0 %v2699_v38, %s2509_s15  ;;  %v3012_v27 = vsel %vm445_vm1, %v467_v32, %v468_v19  ;;  %v3024_v37 = vsel %vm445_vm1, 0.0, %v467_v32 }
  0xbe   : > { %v1053_v54 = vpop.permute.xlu1 %1052  ;;  %v1051_v1 = vpop.permute.xlu0 %1050 }
  0xbf   : > { %v1156_v6 = vsel %vm732_vm4, %v1140_v3, %v1053_v54  ;;  %v1155_v12 = vsel %vm732_vm4, %v1139_v2, %v1051_v1 }
  0xc0   : > { %585 = vrot.lane.b32.xlu1 %v2693_v36, %s2510_s25 }
  0xc1   : > { %583 = vrot.lane.b32.xlu0 %v2699_v38, %s2510_s25 }
  0xc2   : > { %v1102_v60 = vpop.permute.xlu1 %1101  ;;  %v1100_v30 = vpop.permute.xlu0 %1099 }
  0xc3   : > { %v2991_v17 = vsel %vm749_vm3, %v1156_v6, %v1102_v60  ;;  %v2995_v18 = vsel %vm749_vm3, %v1155_v12, %v1100_v30  ;;  %v474_v12 = vrot.slane %v2806_v16, 7 }
  0xc4   : > { %641 = vrot.lane.b32.xlu1 %v2967_v56, %s2508_s12  ;;  %2341 = vmatprep.mubr.msk.f32.mxu1 %vm768_vm5, %v2995_v18 }
  0xc5   : > { %639 = vrot.lane.b32.xlu0 %v2987_v43, %s2508_s12  ;;  %2342 = vmatmul.mubr.msk.f32.gmra.mrb[8].mxu1 %vm768_vm5, %v2991_v17 }
  0xc6   : > { %v1009_v11 = vpop.permute.xlu1 %1008  ;;  %v1007_v22 = vpop.permute.xlu0 %1006 }
  0xc7   : > { %v1142_v31 = vsel %vm715_vm2, %v2693_v36, %v1009_v11  ;;  %v1141_v33 = vsel %vm715_vm2, %v2699_v38, %v1007_v22  ;;  %v470_v38 = vrot.slane %v2762_v59, 7 }
  0xc8   : > { %689 = vrot.lane.b32.xlu1 %v2719_v45, %s2509_s15 }
  0xc9   : > { %687 = vrot.lane.b32.xlu0 %v2726_v47, %s2509_s15  ;;  %v3048_v52 = vsel %vm445_vm1, %v470_v38, %v471_v48  ;;  %v3060_v62 = vsel %vm445_vm1, 0.0, %v470_v38 }
  0xca   : > { %v1057_v21 = vpop.permute.xlu1 %1056  ;;  %v1055_v28 = vpop.permute.xlu0 %1054 }
  0xcb   : > { %v1158_v35 = vsel %vm732_vm4, %v1142_v31, %v1057_v21  ;;  %v1157_v40 = vsel %vm732_vm4, %v1141_v33, %v1055_v28 }
  0xcc   : > { %589 = vrot.lane.b32.xlu1 %v2719_v45, %s2510_s25 }
  0xcd   : > { %587 = vrot.lane.b32.xlu0 %v2726_v47, %s2510_s25 }
  0xce   : > { %v1106_v0 = vpop.permute.xlu1 %1105  ;;  %v1104_v44 = vpop.permute.xlu0 %1103 }
  0xcf   : > { %v3028_v41 = vsel %vm749_vm3, %v1158_v35, %v1106_v0  ;;  %v3031_v36 = vsel %vm749_vm3, %v1157_v40, %v1104_v44 }
  0xd0   : > { %645 = vrot.lane.b32.xlu1 %v3012_v27, %s2508_s12  ;;  %2344 = vmatprep.mubr.msk.f32.mxu1 %vm768_vm5, %v3031_v36 }
  0xd1   : > { %643 = vrot.lane.b32.xlu0 %v3024_v37, %s2508_s12  ;;  %2345 = vmatmul.mubr.msk.f32.gmra.mrb[10].mxu1 %vm768_vm5, %v3028_v41 }
  0xd2   : > { %v1013_v39 = vpop.permute.xlu1 %1012  ;;  %v1011_v26 = vpop.permute.xlu0 %1010 }
  0xd3   : > { %v1144_v60 = vsel %vm715_vm2, %v2719_v45, %v1013_v39  ;;  %v1143_v1 = vsel %vm715_vm2, %v2726_v47, %v1011_v26  ;;  %v473_v47 = vrot.slane %v2804_v13, 7 }
  0xd4   : > { %693 = vrot.lane.b32.xlu1 %v2738_v51, %s2509_s15 }
  0xd5   : > { %691 = vrot.lane.b32.xlu0 %v2744_v53, %s2509_s15  ;;  %v475_v19 = vsel %vm445_vm1, %v473_v47, %v474_v12  ;;  %v504_v35 = vsel %vm445_vm1, 0.0, %v473_v47 }
  0xd6   : > { %v1061_v50 = vpop.permute.xlu1 %1060  ;;  %v1059_v55 = vpop.permute.xlu0 %1058 }
  0xd7   : > { %v1160_v61 = vsel %vm732_vm4, %v1144_v60, %v1061_v50  ;;  %v1159_v2 = vsel %vm732_vm4, %v1143_v1, %v1059_v55  ;;  %v447_v50 = vrot.slane %v2635_v15, 7 }
  0xd8   : > { %593 = vrot.lane.b32.xlu1 %v2738_v51, %s2510_s25 }
  0xd9   : > { %591 = vrot.lane.b32.xlu0 %v2744_v53, %s2510_s25 }
  0xda   : > { %v1110_v54 = vpop.permute.xlu1 %1109  ;;  %v1108_v11 = vpop.permute.xlu0 %1107 }
  0xdb   : > { %v3064_v6 = vsel %vm749_vm3, %v1160_v61, %v1110_v54  ;;  %v3067_v45 = vsel %vm749_vm3, %v1159_v2, %v1108_v11 }
  0xdc   : > { %649 = vrot.lane.b32.xlu1 %v3048_v52, %s2508_s12  ;;  %2347 = vmatprep.mubr.msk.f32.mxu1 %vm768_vm5, %v3067_v45 }
  0xdd   : > { %647 = vrot.lane.b32.xlu0 %v3060_v62, %s2508_s12  ;;  %2348 = vmatmul.mubr.msk.f32.gmra.mrb[12].mxu1 %vm768_vm5, %v3064_v6 }
  0xde   : > { %v1017_v3 = vpop.permute.xlu1 %1016  ;;  %v1015_v32 = vpop.permute.xlu0 %1014 }
  0xdf   : > { %v1146_v0 = vsel %vm715_vm2, %v2738_v51, %v1017_v3  ;;  %v1145_v28 = vsel %vm715_vm2, %v2744_v53, %v1015_v32  ;;  %v446_v53 = vrot.slane %v2633_v14, 7 }
  0xe0   : > { %697 = vrot.lane.b32.xlu1 %v2756_v57, %s2509_s15 }
  0xe1   : > { %695 = vrot.lane.b32.xlu0 %v2762_v59, %s2509_s15  ;;  %v495_v26 = vsel %vm445_vm1, 0.0, %v446_v53  ;;  %v448_v14 = vsel %vm445_vm1, %v446_v53, %v447_v50 }
  0xe2   : > { %v1065_v30 = vpop.permute.xlu1 %1064  ;;  %v1063_v22 = vpop.permute.xlu0 %1062 }
  0xe3   : > { %v1162_v31 = vsel %vm732_vm4, %v1146_v0, %v1065_v30  ;;  %v1161_v39 = vsel %vm732_vm4, %v1145_v28, %v1063_v22 }
  0xe4   : > { %1473 = vrot.lane.b32.xlu1 %v2756_v57, %s2510_s25 }
  0xe5   : > { %1471 = vrot.lane.b32.xlu0 %v2762_v59, %s2510_s25 }
  0xe6   : > { %v1114_v21 = vpop.permute.xlu1 %1113  ;;  %v1112_v44 = vpop.permute.xlu0 %1111 }
  0xe7   : > { %v1178_v40 = vsel %vm749_vm3, %v1162_v31, %v1114_v21  ;;  %v1177_v38 = vsel %vm749_vm3, %v1161_v39, %v1112_v44 }
  0xe8   : > { %1480 = vrot.lane.b32.xlu1 %v475_v19, %s2508_s12  ;;  %2350 = vmatprep.mubr.msk.f32.mxu1 %vm768_vm5, %v1177_v38 }
  0xe9   : > { %1478 = vrot.lane.b32.xlu0 %v504_v35, %s2508_s12  ;;  %2351 = vmatmul.mubr.msk.f32.gmra.mrb[14].mxu1 %vm768_vm5, %v1178_v40 }
  0xea   : > { %v566_v33 = vpop.permute.xlu1 %565  ;;  %2385 = vmatprep.mubr.msk.f32.mxu1 %vm768_vm5, %v2873_v63  ;;  %v564_v48 = vpop.permute.xlu0 %563 }
  0xeb   : > { %v716_v63 = vsel %vm715_vm2, %v495_v26, %v564_v48  ;;  %v717_v55 = vsel %vm715_vm2, %v448_v14, %v566_v33 }
  0xec   : > { %1486 = vrot.lane.b32.xlu1 %v2806_v16, %s2509_s15 }
  0xed   : > { %1484 = vrot.lane.b32.xlu0 %v2804_v13, %s2509_s15  ;;  %2386 = vmatmul.mubr.msk.f32.vlgmr.msra.gmra.mrb[16].mxu1 %vm768_vm5, %v2886_v5 }
  0xee   : > { %v622_v51 = vpop.permute.xlu1 %621  ;;  %2388 = vmatprep.mubr.msk.f32.mxu1 %vm768_vm5, %v2914_v10  ;;  %v620_v54 = vpop.permute.xlu0 %619 }
  0xef   : > { %v733_v13 = vsel %vm732_vm4, %v716_v63, %v620_v54  ;;  %v734_v1 = vsel %vm732_vm4, %v717_v55, %v622_v51 }
  0xf1   : > { %2389 = vmatmul.mubr.msk.f32.gmra.mrb[18].mxu1 %vm768_vm5, %v2911_v25 }
  0xf2   : > { %v1667_v16 = vpop.permute.xlu1 %1666  ;;  %2391 = vmatprep.mubr.msk.f32.mxu1 %vm768_vm5, %v2950_v24  ;;  %v668_v5 = vpop.permute.xlu0 %667 }
  0xf3   : > { %v750_v60 = vsel %vm749_vm3, %v733_v13, %v668_v5  ;;  %v1685_v2 = vsel %vm715_vm2, %v2762_v59, %v1667_v16 }
  0xf4   : > { %2301 = vmatprep.mubr.msk.f32.mxu0 %vm768_vm5, %v750_v60 }
  0xf5   : > { %2392 = vmatmul.mubr.msk.f32.gmra.mrb[20].mxu1 %vm768_vm5, %v2947_v49 }
  0xf6   : > { %v1669_v15 = vpop.permute.xlu1 %1668  ;;  %2394 = vmatprep.mubr.msk.f32.mxu1 %vm768_vm5, %v2995_v18  ;;  %v670_v25 = vpop.permute.xlu0 %669 }
  0xf7   : > { %v751_v61 = vsel %vm749_vm3, %v734_v1, %v670_v25 }
  0xf8   : > { %2302 = vmatmul.mubr.msk.f32.vlgmr.msra.gmra.mrb[0].mxu0 %vm768_vm5, %v751_v61 }
  0xf9   : > { %2395 = vmatmul.mubr.msk.f32.gmra.mrb[22].mxu1 %vm768_vm5, %v2991_v17  ;;  %2420 = vmatpush3.bf16.msra.mxu0 %v2981_v4 }
  0xfa   : > { %v568_v10 = vpop.permute.xlu1 %567  ;;  %2397 = vmatprep.mubr.msk.f32.mxu1 %vm768_vm5, %v3031_v36  ;;  %v1673_v49 = vpop.permute.xlu0 %1672  ;;  %v1686_v36 = vsel %vm715_vm2, %v2756_v57, %v1669_v15 }
  0xfd   : > { %2398 = vmatmul.mubr.msk.f32.gmra.mrb[24].mxu1 %vm768_vm5, %v3028_v41  ;;  %v1687_v41 = vsel %vm732_vm4, %v1685_v2, %v1673_v49 }
  0xfe   : > { %v1680_v24 = vpop.permute.xlu1 %1679  ;;  %2400 = vmatprep.mubr.msk.f32.mxu1 %vm768_vm5, %v3067_v45  ;;  %v1675_v18 = vpop.permute.xlu0 %1674 }
  0xff   : > { %v1689_v11 = vsel %vm749_vm3, %v1687_v41, %v1680_v24  ;;  %v1688_v47 = vsel %vm732_vm4, %v1686_v36, %v1675_v18 }
 0x101   : > { %2401 = vmatmul.mubr.msk.f32.gmra.mrb[26].mxu1 %vm768_vm5, %v3064_v6  ;;  %v718_v6 = vsel %vm715_vm2, %v2799_v8, %v568_v10 }
 0x102   : > { %v624_v3 = vpop.permute.xlu1 %623  ;;  %2403 = vmatprep.mubr.msk.f32.mxu1 %vm768_vm5, %v1177_v38  ;;  %v570_v4 = vpop.permute.xlu0 %569 }
 0x103   : > { %v719_v57 = vsel %vm715_vm2, %v2789_v7, %v570_v4  ;;  %v735_v19 = vsel %vm732_vm4, %v718_v6, %v624_v3 }
 0x105   : > { %2404 = vmatmul.mubr.msk.f32.gmra.mrb[28].mxu1 %vm768_vm5, %v1178_v40 }
 0x106   : > { %v626_v17 = vpop.permute.xlu1 %625  ;;  %v1682_v59 = vpop.permute.xlu0 %1681  ;;  %2406 = vmatprep.mubr.msk.f32.mxu1 %vm768_vm5, %v1689_v11 }
 0x107   : > { %v1690_v12 = vsel %vm749_vm3, %v1688_v47, %v1682_v59  ;;  %v736_v30 = vsel %vm732_vm4, %v719_v57, %v626_v17 }
 0x109   : > { %2407 = vmatmul.mubr.msk.f32.gmra.mrb[30].mxu1 %vm768_vm5, %v1690_v12 }
 0x10a   : > { %v674_v45 = vpop.permute.xlu1 %673  ;;  %v672_v21 = vpop.permute.xlu0 %671 }
 0x10b   : > { %v3159_v22 = vsel %vm749_vm3, %v736_v30, %v674_v45  ;;  %v3162_v0 = vsel %vm749_vm3, %v735_v19, %v672_v21 }
 0x10c   : > { %2304 = vmatprep.mubr.msk.f32.mxu0 %vm768_vm5, %v3162_v0 }
 0x10d   : > { %2305 = vmatmul.mubr.msk.f32.gmra.mrb[2].mxu0 %vm768_vm5, %v3159_v22 }
 0x10e   : > { %v574_v32 = vpop.permute.xlu1 %573  ;;  %v572_v8 = vpop.permute.xlu0 %571 }
 0x10f   : > { %v721_v28 = vsel %vm715_vm2, %v2831_v29, %v574_v32  ;;  %v720_v31 = vsel %vm715_vm2, %v2823_v23, %v572_v8 }
 0x112   : > { %v630_v7 = vpop.permute.xlu1 %629 }
 0x113   : > { %v628_v35 = vpop.permute.xlu0 %627  ;;  %v738_v39 = vsel %vm732_vm4, %v721_v28, %v630_v7 }
 0x114   : > { %v737_v40 = vsel %vm732_vm4, %v720_v31, %v628_v35 }
 0x116   : > { %v678_v33 = vpop.permute.xlu1 %677 }
 0x117   : > { %v676_v38 = vpop.permute.xlu0 %675  ;;  %v3175_v51 = vsel %vm749_vm3, %v738_v39, %v678_v33 }
 0x118   : > { %v3178_v53 = vsel %vm749_vm3, %v737_v40, %v676_v38 }
 0x119   : > { %2307 = vmatprep.mubr.msk.f32.mxu0 %vm768_vm5, %v3178_v53 }
 0x11a   : > { %v578_v44 = vpop.permute.xlu1 %577  ;;  %2308 = vmatmul.mubr.msk.f32.gmra.mrb[4].mxu0 %vm768_vm5, %v3175_v51 }
 0x11b   : > { %v576_v29 = vpop.permute.xlu0 %575  ;;  %v723_v48 = vsel %vm715_vm2, %v2851_v46, %v578_v44 }
 0x11c   : > { %v722_v50 = vsel %vm715_vm2, %v2866_v58, %v576_v29 }
 0x11e   : > { %v634_v23 = vpop.permute.xlu1 %633 }
 0x11f   : > { %v632_v26 = vpop.permute.xlu0 %631  ;;  %v740_v54 = vsel %vm732_vm4, %v723_v48, %v634_v23 }
 0x120   : > { %v739_v14 = vsel %vm732_vm4, %v722_v50, %v632_v26 }
 0x122   : > { %v682_v16 = vpop.permute.xlu1 %681 }
 0x123   : > { %v680_v15 = vpop.permute.xlu0 %679  ;;  %v3191_v13 = vsel %vm749_vm3, %v740_v54, %v682_v16  ;;  %v3264_v54 = vld [vmem:[%s3488_s4] ss:$0 sm:$0xff] }
 0x124   : > { %v756_v5 = vsel %vm749_vm3, %v739_v14, %v680_v15 }
 0x125   : > { %2310 = vmatprep.mubr.msk.f32.mxu0 %vm768_vm5, %v756_v5 }
 0x126   : > { %v582_v63 = vpop.permute.xlu1 %581  ;;  %2311 = vmatmul.mubr.msk.f32.gmra.mrb[6].mxu0 %vm768_vm5, %v3191_v13 }
 0x127   : > { %v580_v58 = vpop.permute.xlu0 %579  ;;  %v725_v55 = vsel %vm715_vm2, %v2895_v9, %v582_v63 }
 0x128   : > { %v724_v60 = vsel %vm715_vm2, %v2907_v20, %v580_v58 }
 0x12a   : > { %v638_v46 = vpop.permute.xlu1 %637 }
 0x12b   : > { %v636_v1 = vpop.permute.xlu0 %635  ;;  %v742_v25 = vsel %vm732_vm4, %v725_v55, %v638_v46 }
 0x12c   : > { %v741_v61 = vsel %vm732_vm4, %v724_v60, %v636_v1 }
 0x12e   : > { %v686_v10 = vpop.permute.xlu1 %685 }
 0x12f   : > { %v684_v49 = vpop.permute.xlu0 %683  ;;  %v759_v3 = vsel %vm749_vm3, %v742_v25, %v686_v10 }
 0x130   : > { %v758_v18 = vsel %vm749_vm3, %v741_v61, %v684_v49 }
 0x131   : > { %2313 = vmatprep.mubr.msk.f32.mxu0 %vm768_vm5, %v758_v18 }
 0x132   : > { %v586_v24 = vpop.permute.xlu1 %585  ;;  %2314 = vmatmul.mubr.msk.f32.gmra.mrb[8].mxu0 %vm768_vm5, %v759_v3 }
 0x133   : > { %v584_v2 = vpop.permute.xlu0 %583  ;;  %v727_v20 = vsel %vm715_vm2, %v2931_v34, %v586_v24 }
 0x134   : > { %v726_v17 = vsel %vm715_vm2, %v2943_v42, %v584_v2 }
 0x136   : > { %v642_v9 = vpop.permute.xlu1 %641 }
 0x137   : > { %v640_v36 = vpop.permute.xlu0 %639  ;;  %v744_v41 = vsel %vm732_vm4, %v727_v20, %v642_v9 }
 0x138   : > { %v743_v11 = vsel %vm732_vm4, %v726_v17, %v640_v36 }
 0x13a   : > { %v690_v4 = vpop.permute.xlu1 %689 }
 0x13b   : > { %v688_v47 = vpop.permute.xlu0 %687  ;;  %v761_v59 = vsel %vm749_vm3, %v744_v41, %v690_v4 }
 0x13c   : > { %v760_v6 = vsel %vm749_vm3, %v743_v11, %v688_v47 }
 0x13d   : > { %2316 = vmatprep.mubr.msk.f32.mxu0 %vm768_vm5, %v760_v6 }
 0x13e   : > { %v590_v45 = vpop.permute.xlu1 %589  ;;  %2317 = vmatmul.mubr.msk.f32.gmra.mrb[10].mxu0 %vm768_vm5, %v761_v59 }
 0x13f   : > { %v588_v12 = vpop.permute.xlu0 %587  ;;  %v729_v42 = vsel %vm715_vm2, %v2967_v56, %v590_v45 }
 0x140   : > { %v728_v57 = vsel %vm715_vm2, %v2987_v43, %v588_v12 }
 0x142   : > { %v646_v34 = vpop.permute.xlu1 %645 }
 0x143   : > { %v644_v32 = vpop.permute.xlu0 %643  ;;  %v746_v19 = vsel %vm732_vm4, %v729_v42, %v646_v34 }
 0x144   : > { %v745_v21 = vsel %vm732_vm4, %v728_v57, %v644_v32 }
 0x146   : > { %v694_v30 = vpop.permute.xlu1 %693 }
 0x147   : > { %v692_v8 = vpop.permute.xlu0 %691  ;;  %v763_v28 = vsel %vm749_vm3, %v746_v19, %v694_v30 }
 0x148   : > { %v762_v31 = vsel %vm749_vm3, %v745_v21, %v692_v8 }
 0x149   : > { %2319 = vmatprep.mubr.msk.f32.mxu0 %vm768_vm5, %v762_v31 }
 0x14a   : > { %v594_v7 = vpop.permute.xlu1 %593  ;;  %2320 = vmatmul.mubr.msk.f32.gmra.mrb[12].mxu0 %vm768_vm5, %v763_v28 }
 0x14b   : > { %v592_v33 = vpop.permute.xlu0 %591  ;;  %v731_v43 = vsel %vm715_vm2, %v3012_v27, %v594_v7 }
 0x14c   : > { %v730_v35 = vsel %vm715_vm2, %v3024_v37, %v592_v33 }
 0x14e   : > { %v650_v56 = vpop.permute.xlu1 %649 }
 0x14f   : > { %v648_v39 = vpop.permute.xlu0 %647  ;;  %v748_v40 = vsel %vm732_vm4, %v731_v43, %v650_v56 }
 0x150   : > { %v747_v38 = vsel %vm732_vm4, %v730_v35, %v648_v39 }
 0x152   : > { %v698_v44 = vpop.permute.xlu1 %697 }
 0x153   : > { %v696_v23 = vpop.permute.xlu0 %695  ;;  %v765_v29 = vsel %vm749_vm3, %v748_v40, %v698_v44 }
 0x154   : > { %v764_v48 = vsel %vm749_vm3, %v747_v38, %v696_v23 }
 0x155   : > { %2322 = vmatprep.mubr.msk.f32.mxu0 %vm768_vm5, %v764_v48 }
 0x156   : > { %2323 = vmatmul.mubr.msk.f32.gmra.mrb[14].mxu0 %vm768_vm5, %v765_v29  ;;  %v1474_v37 = vpop.permute.xlu1 %1473 }
 0x157   : > { %2357 = vmatprep.mubr.msk.f32.mxu0 %vm768_vm5, %v3162_v0  ;;  %v1472_v27 = vpop.permute.xlu0 %1471 }
 0x158   : > { %v1490_v0 = vsel %vm715_vm2, %v3060_v62, %v1472_v27 }
 0x15a   : > { %2358 = vmatmul.mubr.msk.f32.vlgmr.msra.gmra.mrb[16].mxu0 %vm768_vm5, %v3159_v22 }
 0x15b   : > { %2360 = vmatprep.mubr.msk.f32.mxu0 %vm768_vm5, %v3178_v53  ;;  %v1479_v22 = vpop.permute.xlu0 %1478  ;;  %v1491_v53 = vsel %vm715_vm2, %v3048_v52, %v1474_v37 }
 0x15c   : > { %v1492_v50 = vsel %vm732_vm4, %v1490_v0, %v1479_v22 }
 0x15e   : > { %2361 = vmatmul.mubr.msk.f32.gmra.mrb[18].mxu0 %vm768_vm5, %v3175_v51  ;;  %v1481_v51 = vpop.permute.xlu1 %1480 }
 0x15f   : > { %2363 = vmatprep.mubr.msk.f32.mxu0 %vm768_vm5, %v756_v5  ;;  %v1485_v16 = vpop.permute.xlu0 %1484  ;;  %v1493_v26 = vsel %vm732_vm4, %v1491_v53, %v1481_v51 }
 0x160   : > { %v1494_v62 = vsel %vm749_vm3, %v1492_v50, %v1485_v16 }
 0x162   : > { %2364 = vmatmul.mubr.msk.f32.gmra.mrb[20].mxu0 %vm768_vm5, %v3191_v13  ;;  %v1487_v14 = vpop.permute.xlu1 %1486 }
 0x163   : > { %2366 = vmatprep.mubr.msk.f32.mxu0 %vm768_vm5, %v758_v18  ;;  %v1495_v13 = vsel %vm749_vm3, %v1493_v26, %v1487_v14 }
 0x166   : > { %2367 = vmatmul.mubr.msk.f32.gmra.mrb[22].mxu0 %vm768_vm5, %v759_v3 }
 0x167   : > { %2369 = vmatprep.mubr.msk.f32.mxu0 %vm768_vm5, %v760_v6 }
 0x16a   : > { %2370 = vmatmul.mubr.msk.f32.gmra.mrb[24].mxu0 %vm768_vm5, %v761_v59 }
 0x16b   : > { %2372 = vmatprep.mubr.msk.f32.mxu0 %vm768_vm5, %v762_v31 }
 0x16e   : > { %2373 = vmatmul.mubr.msk.f32.gmra.mrb[26].mxu0 %vm768_vm5, %v763_v28 }
 0x16f   : > { %2375 = vmatprep.mubr.msk.f32.mxu0 %vm768_vm5, %v764_v48 }
 0x171   : > { %v2331_v63 = vpop.f32.mrb[0].mxu1 }
 0x172   : > { %2376 = vmatmul.mubr.msk.f32.gmra.mrb[28].mxu0 %vm768_vm5, %v765_v29  ;;  %v1376_v52 = vadd.f32 %v2331_v63, %v3264_v54  ;;  %v1296_v15 = vpop.f32.mrb[1].mxu1 }
 0x173   : > { %2378 = vmatprep.mubr.msk.f32.mxu0 %vm768_vm5, %v1494_v62  ;;  %v1375_v5 = vadd.f32 %v3264_v54, %v1296_v15 }
 0x174   : > { %1409 = vrot.lane.b32.xlu1 %v1376_v52, %s2510_s25 }
 0x175   : > { %v2334_v46 = vpop.f32.mrb[2].mxu1  ;;  %1407 = vrot.lane.b32.xlu0 %v1375_v5, %s2510_s25 }
 0x176   : > { %2379 = vmatmul.mubr.msk.f32.gmra.mrb[30].mxu0 %vm768_vm5, %v1495_v13  ;;  %v1378_v58 = vadd.f32 %v2334_v46, %v3264_v54  ;;  %v1306_v55 = vpop.f32.mrb[3].mxu1 }
 0x177   : > { %v1377_v60 = vadd.f32 %v3264_v54, %v1306_v55 }
 0x178   : > { %1413 = vrot.lane.b32.xlu1 %v1378_v58, %s2510_s25 }
 0x179   : > { %1411 = vrot.lane.b32.xlu0 %v1377_v60, %s2510_s25 }
 0x180   : > { %v2337_v10 = vpop.f32.mrb[4].mxu1 }
 0x181   : > { %v1380_v1 = vadd.f32 %v2337_v10, %v3264_v54  ;;  %v1316_v25 = vpop.f32.mrb[5].mxu1 }
 0x182   : > { %v1379_v61 = vadd.f32 %v3264_v54, %v1316_v25 }
 0x183   : > { %1417 = vrot.lane.b32.xlu1 %v1380_v1, %s2510_s25 }
 0x184   : > { %1415 = vrot.lane.b32.xlu0 %v1379_v61, %s2510_s25 }
 0x18c   : > { %v2340_v24 = vpop.f32.mrb[6].mxu1 }
 0x18d   : > { %v1382_v49 = vadd.f32 %v2340_v24, %v3264_v54  ;;  %v1326_v3 = vpop.f32.mrb[7].mxu1 }
 0x18e   : > { %v1381_v18 = vadd.f32 %v3264_v54, %v1326_v3 }
 0x18f   : > { %1421 = vrot.lane.b32.xlu1 %v1382_v49, %s2510_s25 }
 0x190   : > { %1419 = vrot.lane.b32.xlu0 %v1381_v18, %s2510_s25 }
 0x198   : > { %v2343_v9 = vpop.f32.mrb[8].mxu1 }
 0x199   : > { %v1384_v2 = vadd.f32 %v2343_v9, %v3264_v54  ;;  %v1336_v20 = vpop.f32.mrb[9].mxu1 }
 0x19a   : > { %v1383_v17 = vadd.f32 %v3264_v54, %v1336_v20 }
 0x19b   : > { %1425 = vrot.lane.b32.xlu1 %v1384_v2, %s2510_s25 }
 0x19c   : > { %1423 = vrot.lane.b32.xlu0 %v1383_v17, %s2510_s25 }
 0x1a4   : > { %v2346_v4 = vpop.f32.mrb[10].mxu1 }
 0x1a5   : > { %v1386_v36 = vadd.f32 %v2346_v4, %v3264_v54  ;;  %v1346_v41 = vpop.f32.mrb[11].mxu1 }
 0x1a6   : > { %v1385_v11 = vadd.f32 %v3264_v54, %v1346_v41 }
 0x1a7   : > { %1429 = vrot.lane.b32.xlu1 %v1386_v36, %s2510_s25 }
 0x1a8   : > { %1427 = vrot.lane.b32.xlu0 %v1385_v11, %s2510_s25 }
 0x1b0   : > { %v2349_v45 = vpop.f32.mrb[12].mxu1 }
 0x1b1   : > { %v1388_v47 = vadd.f32 %v2349_v45, %v3264_v54  ;;  %v1356_v59 = vpop.f32.mrb[13].mxu1 }
 0x1b2   : > { %v1387_v6 = vadd.f32 %v3264_v54, %v1356_v59 }
 0x1b3   : > { %1433 = vrot.lane.b32.xlu1 %v1388_v47, %s2510_s25 }
 0x1b4   : > { %1431 = vrot.lane.b32.xlu0 %v1387_v6, %s2510_s25 }
 0x1bc   : > { %v2352_v34 = vpop.f32.mrb[14].mxu1 }
 0x1bd   : > { %v1390_v12 = vadd.f32 %v2352_v34, %v3264_v54  ;;  %v1366_v42 = vpop.f32.mrb[15].mxu1 }
 0x1be   : > { %v1389_v57 = vadd.f32 %v3264_v54, %v1366_v42 }
 0x1bf   : > { %1437 = vrot.lane.b32.xlu1 %v1390_v12, %s2510_s25 }
 0x1c0   : > { %v2387_v30 = vpop.f32.mrb[16].mxu1  ;;  %1435 = vrot.lane.b32.xlu0 %v1389_v57, %s2510_s25 }
 0x1c1   : > { %v1846_v32 = vadd.f32 %v2387_v30, %v3264_v54  ;;  %v1766_v19 = vpop.f32.mrb[17].mxu1 }
 0x1c2   : > { %v1845_v21 = vadd.f32 %v3264_v54, %v1766_v19 }
 0x1c3   : > { %1879 = vrot.lane.b32.xlu1 %v1846_v32, %s2510_s25 }
 0x1c4   : > { %v2390_v7 = vpop.f32.mrb[18].mxu1  ;;  %1877 = vrot.lane.b32.xlu0 %v1845_v21, %s2510_s25 }
 0x1c5   : > { %v1848_v8 = vadd.f32 %v2390_v7, %v3264_v54  ;;  %v1776_v28 = vpop.f32.mrb[19].mxu1 }
 0x1c6   : > { %v1847_v31 = vadd.f32 %v3264_v54, %v1776_v28 }
 0x1c7   : > { %1883 = vrot.lane.b32.xlu1 %v1848_v8, %s2510_s25 }
 0x1c8   : > { %v2393_v56 = vpop.f32.mrb[20].mxu1  ;;  %1881 = vrot.lane.b32.xlu0 %v1847_v31, %s2510_s25 }
 0x1c9   : > { %v1850_v33 = vadd.f32 %v2393_v56, %v3264_v54  ;;  %v1786_v43 = vpop.f32.mrb[21].mxu1 }
 0x1ca   : > { %v1849_v35 = vadd.f32 %v3264_v54, %v1786_v43 }
 0x1cb   : > { %1887 = vrot.lane.b32.xlu1 %v1850_v33, %s2510_s25  ;;  %v2303_v39 = vpop.f32.mrb[0].mxu0 }
 0x1cc   : > { %v2396_v40 = vpop.f32.mrb[22].mxu1  ;;  %1885 = vrot.lane.b32.xlu0 %v1849_v35, %s2510_s25  ;;  %v883_v44 = vpop.f32.mrb[1].mxu0  ;;  %v963_v58 = vadd.f32 %v2303_v39, %v3264_v54 }
 0x1cd   : > { %v1852_v38 = vadd.f32 %v2396_v40, %v3264_v54  ;;  %v1796_v23 = vpop.f32.mrb[23].mxu1  ;;  %v962_v55 = vadd.f32 %v3264_v54, %v883_v44 }
 0x1ce   : > { %v1851_v29 = vadd.f32 %v3264_v54, %v1796_v23 }
 0x1cf   : > { %1891 = vrot.lane.b32.xlu1 %v1852_v38, %s2510_s25 }
 0x1d0   : > { %v2399_v48 = vpop.f32.mrb[24].mxu1  ;;  %1889 = vrot.lane.b32.xlu0 %v1851_v29, %s2510_s25 }
 0x1d1   : > { %v1854_v27 = vadd.f32 %v2399_v48, %v3264_v54  ;;  %v1806_v37 = vpop.f32.mrb[25].mxu1 }
 0x1d2   : > { %v1853_v22 = vadd.f32 %v3264_v54, %v1806_v37 }
 0x1d3   : > { %1895 = vrot.lane.b32.xlu1 %v1854_v27, %s2510_s25 }
 0x1d4   : > { %v2402_v0 = vpop.f32.mrb[26].mxu1  ;;  %1893 = vrot.lane.b32.xlu0 %v1853_v22, %s2510_s25 }
 0x1d5   : > { %v1856_v51 = vadd.f32 %v2402_v0, %v3264_v54  ;;  %v1816_v53 = vpop.f32.mrb[27].mxu1 }
 0x1d6   : > { %v1855_v50 = vadd.f32 %v3264_v54, %v1816_v53 }
 0x1d7   : > { %1899 = vrot.lane.b32.xlu1 %v1856_v51, %s2510_s25 }
 0x1d8   : > { %v2405_v16 = vpop.f32.mrb[28].mxu1  ;;  %1897 = vrot.lane.b32.xlu0 %v1855_v50, %s2510_s25 }
 0x1d9   : > { %v1858_v26 = vadd.f32 %v2405_v16, %v3264_v54  ;;  %v1826_v62 = vpop.f32.mrb[29].mxu1 }
 0x1da   : > { %v1857_v14 = vadd.f32 %v3264_v54, %v1826_v62 }
 0x1db   : > { %1903 = vrot.lane.b32.xlu1 %v1858_v26, %s2510_s25 }
 0x1dc   : > { %1901 = vrot.lane.b32.xlu0 %v1857_v14, %s2510_s25  ;;  %v2408_v63 = vpop.f32.mrb[30].mxu1 }
 0x1dd   : > { %v1860_v52 = vadd.f32 %v2408_v63, %v3264_v54  ;;  %v1836_v15 = vpop.f32.mrb[31].mxu1 }
 0x1de   : > { %v1859_v13 = vadd.f32 %v3264_v54, %v1836_v15 }
 0x1df   : > { %1907 = vrot.lane.b32.xlu1 %v1860_v52, %s2510_s25 }
 0x1e0   : > { %1905 = vrot.lane.b32.xlu0 %v1859_v13, %s2510_s25  ;;  %v2306_v5 = vpop.f32.mrb[2].mxu0 }
 0x1e1   : > { %v893_v46 = vpop.f32.mrb[3].mxu0  ;;  %v965_v61 = vadd.f32 %v2306_v5, %v3264_v54 }
 0x1e2   : > { %v964_v24 = vadd.f32 %v3264_v54, %v893_v46 }
 0x1e6   : > { %v1410_v60 = vpop.permute.xlu1 %1409 }
 0x1e7   : > { %v1456_v10 = vsel %vm715_vm2, %v963_v58, %v1410_v60  ;;  %v1408_v1 = vpop.permute.xlu0 %1407 }
 0x1e8   : > { %1942 = vst.msk [vmem:[%s3339_s30 + $0x8] sm:$0xff] %vm732_vm4, %v1456_v10  ;;  %v1455_v25 = vsel %vm715_vm2, %v962_v55, %v1408_v1 }
 0x1e9   : > { %1941 = vst.msk [vmem:[%s3339_s30] sm:$0xff] %vm732_vm4, %v1455_v25 }
 0x1ea   : > { %v1414_v49 = vpop.permute.xlu1 %1413 }
 0x1eb   : > { %v1458_v3 = vsel %vm715_vm2, %v965_v61, %v1414_v49  ;;  %v1412_v18 = vpop.permute.xlu0 %1411 }
 0x1ec   : > { %1946 = vst.msk [vmem:[%s3339_s30 + $0x28] sm:$0xff] %vm732_vm4, %v1458_v3  ;;  %v1457_v9 = vsel %vm715_vm2, %v964_v24, %v1412_v18 }
 0x1ed   : > { %v2309_v2 = vpop.f32.mrb[4].mxu0  ;;  %1945 = vst.msk [vmem:[%s3339_s30 + $0x20] sm:$0xff] %vm732_vm4, %v1457_v9 }
 0x1ee   : > { %v903_v20 = vpop.f32.mrb[5].mxu0  ;;  %v967_v17 = vadd.f32 %v2309_v2, %v3264_v54 }
 0x1ef   : > { %v966_v4 = vadd.f32 %v3264_v54, %v903_v20 }
 0x1f5   : > { %v1418_v36 = vpop.permute.xlu1 %1417 }
 0x1f6   : > { %v1460_v41 = vsel %vm715_vm2, %v967_v17, %v1418_v36  ;;  %v1416_v11 = vpop.permute.xlu0 %1415 }
 0x1f7   : > { %1950 = vst.msk [vmem:[%s3339_s30 + $0x48] sm:$0xff] %vm732_vm4, %v1460_v41  ;;  %v1459_v45 = vsel %vm715_vm2, %v966_v4, %v1416_v11 }
 0x1f8   : > { %1949 = vst.msk [vmem:[%s3339_s30 + $0x40] sm:$0xff] %vm732_vm4, %v1459_v45 }
 0x1f9   : > { %v2312_v47 = vpop.f32.mrb[6].mxu0 }
 0x1fa   : > { %v913_v59 = vpop.f32.mrb[7].mxu0  ;;  %v969_v6 = vadd.f32 %v2312_v47, %v3264_v54 }
 0x1fb   : > { %v968_v34 = vadd.f32 %v3264_v54, %v913_v59 }
 0x201   : > { %v1422_v12 = vpop.permute.xlu1 %1421 }
 0x202   : > { %v1462_v42 = vsel %vm715_vm2, %v969_v6, %v1422_v12  ;;  %v1420_v57 = vpop.permute.xlu0 %1419 }
 0x203   : > { %1954 = vst.msk [vmem:[%s3339_s30 + $0x68] sm:$0xff] %vm732_vm4, %v1462_v42  ;;  %v1461_v30 = vsel %vm715_vm2, %v968_v34, %v1420_v57 }
 0x204   : > { %1953 = vst.msk [vmem:[%s3339_s30 + $0x60] sm:$0xff] %vm732_vm4, %v1461_v30 }
 0x205   : > { %v2315_v32 = vpop.f32.mrb[8].mxu0 }
 0x206   : > { %v923_v19 = vpop.f32.mrb[9].mxu0  ;;  %v971_v21 = vadd.f32 %v2315_v32, %v3264_v54 }
 0x207   : > { %v970_v7 = vadd.f32 %v3264_v54, %v923_v19 }
 0x20d   : > { %v1426_v8 = vpop.permute.xlu1 %1425 }
 0x20e   : > { %v1464_v28 = vsel %vm715_vm2, %v971_v21, %v1426_v8  ;;  %v1424_v31 = vpop.permute.xlu0 %1423 }
 0x20f   : > { %1958 = vst.msk [vmem:[%s3339_s30 + $0x88] sm:$0xff] %vm732_vm4, %v1464_v28  ;;  %v1463_v56 = vsel %vm715_vm2, %v970_v7, %v1424_v31 }
 0x210   : > { %1957 = vst.msk [vmem:[%s3339_s30 + $0x80] sm:$0xff] %vm732_vm4, %v1463_v56 }
 0x211   : > { %v2318_v33 = vpop.f32.mrb[10].mxu0 }
 0x212   : > { %v933_v43 = vpop.f32.mrb[11].mxu0  ;;  %v973_v35 = vadd.f32 %v2318_v33, %v3264_v54 }
 0x213   : > { %v972_v39 = vadd.f32 %v3264_v54, %v933_v43 }
 0x219   : > { %v1430_v40 = vpop.permute.xlu1 %1429 }
 0x21a   : > { %v1466_v44 = vsel %vm715_vm2, %v973_v35, %v1430_v40  ;;  %v1428_v38 = vpop.permute.xlu0 %1427 }
 0x21b   : > { %1962 = vst.msk [vmem:[%s3339_s30 + $0xa8] sm:$0xff] %vm732_vm4, %v1466_v44  ;;  %v1465_v23 = vsel %vm715_vm2, %v972_v39, %v1428_v38 }
 0x21c   : > { %1961 = vst.msk [vmem:[%s3339_s30 + $0xa0] sm:$0xff] %vm732_vm4, %v1465_v23 }
 0x21d   : > { %v2321_v29 = vpop.f32.mrb[12].mxu0 }
 0x21e   : > { %v943_v48 = vpop.f32.mrb[13].mxu0  ;;  %v975_v27 = vadd.f32 %v2321_v29, %v3264_v54 }
 0x21f   : > { %v974_v37 = vadd.f32 %v3264_v54, %v943_v48 }
 0x225   : > { %v1434_v22 = vpop.permute.xlu1 %1433 }
 0x226   : > { %v1468_v0 = vsel %vm715_vm2, %v975_v27, %v1434_v22  ;;  %v1432_v51 = vpop.permute.xlu0 %1431 }
 0x227   : > { %1966 = vst.msk [vmem:[%s3339_s30 + $0xc8] sm:$0xff] %vm732_vm4, %v1468_v0  ;;  %v1467_v53 = vsel %vm715_vm2, %v974_v37, %v1432_v51 }
 0x228   : > { %1965 = vst.msk [vmem:[%s3339_s30 + $0xc0] sm:$0xff] %vm732_vm4, %v1467_v53 }
 0x229   : > { %v2324_v50 = vpop.f32.mrb[14].mxu0 }
 0x22a   : > { %v953_v16 = vpop.f32.mrb[15].mxu0  ;;  %v977_v14 = vadd.f32 %v2324_v50, %v3264_v54 }
 0x22b   : > { %v976_v52 = vadd.f32 %v3264_v54, %v953_v16 }
 0x22d   : > { %v2359_v26 = vpop.f32.mrb[16].mxu0 }
 0x22e   : > { %v1571_v62 = vpop.f32.mrb[17].mxu0  ;;  %v1651_v55 = vadd.f32 %v2359_v26, %v3264_v54 }
 0x22f   : > { %v1650_v10 = vadd.f32 %v3264_v54, %v1571_v62 }
 0x231   : > { %v2362_v63 = vpop.f32.mrb[18].mxu0  ;;  %v1438_v15 = vpop.permute.xlu1 %1437 }
 0x232   : > { %v1581_v13 = vpop.f32.mrb[19].mxu0  ;;  %v1470_v5 = vsel %vm715_vm2, %v977_v14, %v1438_v15  ;;  %v1436_v46 = vpop.permute.xlu0 %1435  ;;  %v1653_v3 = vadd.f32 %v2362_v63, %v3264_v54 }
 0x233   : > { %1970 = vst.msk [vmem:[%s3339_s30 + $0xe8] sm:$0xff] %vm732_vm4, %v1470_v5  ;;  %v1469_v58 = vsel %vm715_vm2, %v976_v52, %v1436_v46  ;;  %v1652_v9 = vadd.f32 %v3264_v54, %v1581_v13 }
 0x234   : > { %1969 = vst.msk [vmem:[%s3339_s30 + $0xe0] sm:$0xff] %vm732_vm4, %v1469_v58 }
 0x235   : > { %v2365_v60 = vpop.f32.mrb[20].mxu0  ;;  %v1880_v1 = vpop.permute.xlu1 %1879 }
 0x236   : > { %v1591_v25 = vpop.f32.mrb[21].mxu0  ;;  %v1926_v61 = vsel %vm715_vm2, %v1651_v55, %v1880_v1  ;;  %v1878_v24 = vpop.permute.xlu0 %1877  ;;  %v1655_v41 = vadd.f32 %v2365_v60, %v3264_v54 }
 0x237   : > { %1944 = vst.msk [vmem:[%s3339_s30 + $0x18] sm:$0xff] %vm732_vm4, %v1926_v61  ;;  %v1925_v49 = vsel %vm715_vm2, %v1650_v10, %v1878_v24  ;;  %v1654_v45 = vadd.f32 %v3264_v54, %v1591_v25 }
 0x238   : > { %1943 = vst.msk [vmem:[%s3339_s30 + $0x10] sm:$0xff] %vm732_vm4, %v1925_v49 }
 0x239   : > { %v2368_v18 = vpop.f32.mrb[22].mxu0  ;;  %v1884_v2 = vpop.permute.xlu1 %1883 }
 0x23a   : > { %v1601_v20 = vpop.f32.mrb[23].mxu0  ;;  %v1928_v17 = vsel %vm715_vm2, %v1653_v3, %v1884_v2  ;;  %v1882_v4 = vpop.permute.xlu0 %1881  ;;  %v1657_v42 = vadd.f32 %v2368_v18, %v3264_v54 }
 0x23b   : > { %1948 = vst.msk [vmem:[%s3339_s30 + $0x38] sm:$0xff] %vm732_vm4, %v1928_v17  ;;  %v1927_v36 = vsel %vm715_vm2, %v1652_v9, %v1882_v4  ;;  %v1656_v30 = vadd.f32 %v3264_v54, %v1601_v20 }
 0x23c   : > { %1947 = vst.msk [vmem:[%s3339_s30 + $0x30] sm:$0xff] %vm732_vm4, %v1927_v36 }
 0x23d   : > { %v2371_v11 = vpop.f32.mrb[24].mxu0  ;;  %v1888_v47 = vpop.permute.xlu1 %1887 }
 0x23e   : > { %v1611_v59 = vpop.f32.mrb[25].mxu0  ;;  %v1930_v6 = vsel %vm715_vm2, %v1655_v41, %v1888_v47  ;;  %v1886_v34 = vpop.permute.xlu0 %1885  ;;  %v1659_v28 = vadd.f32 %v2371_v11, %v3264_v54 }
 0x23f   : > { %1952 = vst.msk [vmem:[%s3339_s30 + $0x58] sm:$0xff] %vm732_vm4, %v1930_v6  ;;  %v1929_v12 = vsel %vm715_vm2, %v1654_v45, %v1886_v34  ;;  %v1658_v56 = vadd.f32 %v3264_v54, %v1611_v59 }
 0x240   : > { %1951 = vst.msk [vmem:[%s3339_s30 + $0x50] sm:$0xff] %vm732_vm4, %v1929_v12 }
 0x241   : > { %v2374_v57 = vpop.f32.mrb[26].mxu0  ;;  %v1892_v32 = vpop.permute.xlu1 %1891 }
 0x242   : > { %v1621_v19 = vpop.f32.mrb[27].mxu0  ;;  %v1932_v21 = vsel %vm715_vm2, %v1657_v42, %v1892_v32  ;;  %v1890_v7 = vpop.permute.xlu0 %1889  ;;  %v1661_v44 = vadd.f32 %v2374_v57, %v3264_v54 }
 0x243   : > { %1956 = vst.msk [vmem:[%s3339_s30 + $0x78] sm:$0xff] %vm732_vm4, %v1932_v21  ;;  %v1931_v8 = vsel %vm715_vm2, %v1656_v30, %v1890_v7  ;;  %v1660_v23 = vadd.f32 %v3264_v54, %v1621_v19 }
 0x244   : > { %1955 = vst.msk [vmem:[%s3339_s30 + $0x70] sm:$0xff] %vm732_vm4, %v1931_v8 }
 0x245   : > { %v2377_v31 = vpop.f32.mrb[28].mxu0  ;;  %v1896_v33 = vpop.permute.xlu1 %1895 }
 0x246   : > { %v1631_v43 = vpop.f32.mrb[29].mxu0  ;;  %v1934_v35 = vsel %vm715_vm2, %v1659_v28, %v1896_v33  ;;  %v1894_v39 = vpop.permute.xlu0 %1893  ;;  %v1663_v0 = vadd.f32 %v2377_v31, %v3264_v54 }
 0x247   : > { %1960 = vst.msk [vmem:[%s3339_s30 + $0x98] sm:$0xff] %vm732_vm4, %v1934_v35  ;;  %v1933_v40 = vsel %vm715_vm2, %v1658_v56, %v1894_v39  ;;  %v1662_v51 = vadd.f32 %v3264_v54, %v1631_v43 }
 0x248   : > { %1959 = vst.msk [vmem:[%s3339_s30 + $0x90] sm:$0xff] %vm732_vm4, %v1933_v40 }
 0x249   : > { %v2380_v38 = vpop.f32.mrb[30].mxu0  ;;  %v1900_v29 = vpop.permute.xlu1 %1899 }
 0x24a   : > { %v1641_v48 = vpop.f32.mrb[31].mxu0  ;;  %v1936_v27 = vsel %vm715_vm2, %v1661_v44, %v1900_v29  ;;  %v1898_v37 = vpop.permute.xlu0 %1897  ;;  %v1665_v62 = vadd.f32 %v2380_v38, %v3264_v54 }
 0x24b   : > { %1964 = vst.msk [vmem:[%s3339_s30 + $0xb8] sm:$0xff] %vm732_vm4, %v1936_v27  ;;  %v1935_v22 = vsel %vm715_vm2, %v1660_v23, %v1898_v37  ;;  %v1664_v14 = vadd.f32 %v3264_v54, %v1641_v48 }
 0x24c   : > { %1963 = vst.msk [vmem:[%s3339_s30 + $0xb0] sm:$0xff] %vm732_vm4, %v1935_v22 }
 0x24d   : > { %v1904_v53 = vpop.permute.xlu1 %1903 }
 0x24e   : > { %v1938_v50 = vsel %vm715_vm2, %v1663_v0, %v1904_v53  ;;  %v1902_v16 = vpop.permute.xlu0 %1901 }
 0x24f   : > { %1968 = vst.msk [vmem:[%s3339_s30 + $0xd8] sm:$0xff] %vm732_vm4, %v1938_v50  ;;  %v1937_v26 = vsel %vm715_vm2, %v1662_v51, %v1902_v16 }
 0x250   : > { %1967 = vst.msk [vmem:[%s3339_s30 + $0xd0] sm:$0xff] %vm732_vm4, %v1937_v26 }
 0x251   : > { %v1908_v63 = vpop.permute.xlu1 %1907 }
 0x252   : > { %v1940_v52 = vsel %vm715_vm2, %v1665_v62, %v1908_v63  ;;  %v1906_v15 = vpop.permute.xlu0 %1905 }
 0x253   : > { %1972 = vst.msk [vmem:[%s3339_s30 + $0xf8] sm:$0xff] %vm732_vm4, %v1940_v52  ;;  %v1939_v13 = vsel %vm715_vm2, %v1664_v14, %v1906_v15 }
 0x254   : > { %1971 = vst.msk [vmem:[%s3339_s30 + $0xf0] sm:$0xff] %vm732_vm4, %v1939_v13 }
 0x255 PF: > { %s15_s22 = sadd.s32 1, %s2506_s22   ;;  %s3491_s18 = smov %s2498_s20 }
 0x256   : > { %p12_p12 = scmp.ge.s32.totalorder %s15_s22, 6   ;;  %s3492_s19 = smov %s2502_s21 }
 0x257   : > { %s3493_s20 = smov %s3496_s23  ;;  %s3494_s21 = smov %s3500_s24 }
 0x258   :  { %14 = sbr.rel (!%p12_p12) target bundleno = 3 (0x3), region = 79 }

</bundles_post_ra>
